<compile_context>
chip_gen: v7x
topology: tpu7x:2x2x1
jax: 0.10.0
libtpu: 0.0.40
codegen_flags: <defaults>
</compile_context>

<pallas_src>
import jax
import jax.numpy as jnp
import numpy as np
from jax.experimental import pallas as pl
from jax.experimental.pallas import tpu as pltpu

# Shapes consistent with the PyTorch module
LSTM_INPUT = 16
LSTM_HIDDEN = 32
SEQ_LEN = 8              # forward reads output[:, 3, :] -> only steps 0..3 matter
LSTM_STEPS = 4
BATCH = 2
CNN_CIN = 4
CNN_LEN = 40             # Conv1d(k=10) -> 31, MaxPool1d(2) -> 15, 8*15 = 120 (fc in)
CONV_K = 10
C1_OUT = 8
CONV_OUT_LEN = CNN_LEN - CONV_K + 1      # 31
POOL_LEN = CONV_OUT_LEN // 2             # 15 (floor mode; conv position 30 is dropped)
POOL_POS = 2 * POOL_LEN                  # 30 conv positions actually consumed
KC = CONV_K * CNN_CIN                    # 40 values per im2col patch
PATCH_W = POOL_POS * KC                  # 1200
CNN_FC_IN = C1_OUT * POOL_LEN            # 120
CNN_FC_OUT = 64
OUT_DIM = 4


# ----------------------------------------------------------------------------
# Kernel
# ----------------------------------------------------------------------------
def cnn_lstm_kernel(lstm_x_ref, patches_ref,
                    w_ih_ref, w_hh_ref, b_lstm_ref,
                    w_pool_even_ref, w_pool_odd_ref, b_c1_ref,
                    w_c2_ref, b_c2_ref,
                    w_cnn_ref, w_out_l_ref, b_out_ref,
                    out_ref):
    B = out_ref.shape[0]
    H = w_hh_ref.shape[0]

    # ---------------- LSTM (PyTorch gate order i, f, g, o) ----------------
    # Input projection for all 4 timesteps in one matmul (hoisted out of the
    # recurrence); lstm_x_ref is (4*B, D) time-major.
    x_proj = (jnp.dot(lstm_x_ref[...], w_ih_ref[...],
                      preferred_element_type=jnp.float32)
              + b_lstm_ref[...])                                  # (4B, 4H)
    w_hh = w_hh_ref[...]

    def lstm_cell(gates, c_prev):
        # Full-vreg nonlinearities, then 32-lane slices (2 EUP pushes + tanh(c)).
        sig = pl.reciprocal(1.0 + jnp.exp(-gates), approx=True)   # i, f, o
        th = jnp.tanh(gates)                                      # g
        c_new = sig[:, H:2 * H] * c_prev + sig[:, 0:H] * th[:, 2 * H:3 * H]
        h_new = sig[:, 3 * H:4 * H] * jnp.tanh(c_new)
        return h_new, c_new

    h, c = lstm_cell(x_proj[0:B, :], jnp.zeros((B, H), jnp.float32))
    for t in range(1, LSTM_STEPS):
        gates = x_proj[t * B:(t + 1) * B, :] + jnp.dot(
            h, w_hh, preferred_element_type=jnp.float32)
        h, c = lstm_cell(gates, c)
    lstm_out = h                                                  # (B, H)

    # ---------------- CNN branch (fully batched, no reshapes) ----------------
    # Conv1d(4->8, k=10) + ReLU + MaxPool1d(2):
    #   patches (B, 1200) x block-structured weights -> even / odd conv
    #   positions already laid out as the flattened (t, channel) pooled grid.
    pats = patches_ref[...]
    y_even = jnp.dot(pats, w_pool_even_ref[...],
                     preferred_element_type=jnp.float32)          # (B, 120)
    y_odd = jnp.dot(pats, w_pool_odd_ref[...],
                    preferred_element_type=jnp.float32)           # (B, 120)
    pooled = jnp.maximum(jnp.maximum(y_even, y_odd) + b_c1_ref[...], 0.0)

    # Conv1d(8->8, k=1) + ReLU as one block-diagonal (120, 120) matmul.
    z = jnp.maximum(jnp.dot(pooled, w_c2_ref[...],
                            preferred_element_type=jnp.float32)
                    + b_c2_ref[...], 0.0)                         # (B, 120)

    # Flatten + Linear(120, 64) is linear and feeds straight into the final
    # Linear(96, 4); both are fused into w_cnn (120, 4) / b_out at init time.
    out = (jnp.dot(lstm_out, w_out_l_ref[...], preferred_element_type=jnp.float32)
           + jnp.dot(z, w_cnn_ref[...], preferred_element_type=jnp.float32)
           + b_out_ref[...])                                      # (B, 4)
    out_ref[...] = out.astype(out_ref.dtype)


# ----------------------------------------------------------------------------
# Wrapper
# ----------------------------------------------------------------------------
def cnn_lstm_mix_forward(lstm_input, cnn_input, kp):
    """lstm_input: (B, T, D) batch-first; cnn_input: (B, C_in, L) NCW."""
    B = lstm_input.shape[0]

    # Time-major first 4 timesteps flattened to (4B, D) for one input matmul.
    lstm_flat = jnp.transpose(lstm_input[:, :LSTM_STEPS, :], (1, 0, 2)) \
                   .reshape(LSTM_STEPS * B, LSTM_INPUT).astype(jnp.float32)

    # im2col in the wrapper: patches[b, p*40 + k*4 + c] = x[b, c, p+k] for the
    # 30 conv positions consumed by MaxPool1d(2).
    x_cl = jnp.transpose(cnn_input, (0, 2, 1)).astype(jnp.float32)   # (B, L, C)
    patches = jnp.concatenate(
        [x_cl[:, p:p + CONV_K, :].reshape(B, KC) for p in range(POOL_POS)],
        axis=1)                                                      # (B, 1200)

    args = (lstm_flat, patches,
            kp["w_ih"], kp["w_hh"], kp["b_lstm"],
            kp["w_pool_even"], kp["w_pool_odd"], kp["b_c1"],
            kp["w_c2"], kp["b_c2"],
            kp["w_cnn"], kp["w_out_l"], kp["b_out"])

    return pl.pallas_call(
        cnn_lstm_kernel,
        out_shape=jax.ShapeDtypeStruct((B, OUT_DIM), jnp.float32),
        in_specs=[pl.BlockSpec(memory_space=pltpu.MemorySpace.VMEM)
                  for _ in args],
        out_specs=pl.BlockSpec(memory_space=pltpu.MemorySpace.VMEM),
    )(*args)


# ----------------------------------------------------------------------------
# Parameters: PyTorch-shaped init, then conversion to kernel layouts.
# ----------------------------------------------------------------------------
def init_params(key):
    ks = jax.random.split(key, 12)

    def u(k, shape, fan):
        bound = 1.0 / np.sqrt(fan)
        return jax.random.uniform(k, shape, jnp.float32, -bound, bound)

    H = LSTM_HIDDEN
    return dict(
        w_ih=u(ks[0], (4 * H, LSTM_INPUT), H),          # nn.LSTM weight_ih_l0
        w_hh=u(ks[1], (4 * H, H), H),                   # nn.LSTM weight_hh_l0
        b_ih=u(ks[2], (4 * H,), H),
        b_hh=u(ks[3], (4 * H,), H),
        w1=u(ks[4], (C1_OUT, CNN_CIN, CONV_K), CNN_CIN * CONV_K),  # Conv1d(4,8,10)
        b1=u(ks[5], (C1_OUT,), CNN_CIN * CONV_K),
        w2=u(ks[6], (C1_OUT, C1_OUT, 1), C1_OUT),                  # Conv1d(8,8,1)
        b2=u(ks[7], (C1_OUT,), C1_OUT),
        wfc1=u(ks[8], (CNN_FC_OUT, CNN_FC_IN), CNN_FC_IN),         # Linear(120,64)
        bfc1=u(ks[9], (CNN_FC_OUT,), CNN_FC_IN),
        wout=u(ks[10], (OUT_DIM, CNN_FC_OUT + H), CNN_FC_OUT + H), # Linear(96,4)
        bout=u(ks[11], (OUT_DIM,), CNN_FC_OUT + H),
    )


def prepare_kernel_params(p):
    """Build the block-structured / fused weights consumed by the kernel."""
    H = LSTM_HIDDEN

    # Conv1 weight in (k*4 + c_in, c_out) "patch" order.
    w_c1f = np.transpose(np.asarray(p["w1"]), (2, 1, 0)).reshape(KC, C1_OUT)

    # Block-structured conv+pool weights: even / odd conv positions mapped
    # straight into the flattened (t, channel) pooled layout.
    w_even = np.zeros((PATCH_W, CNN_FC_IN), np.float32)
    w_odd = np.zeros((PATCH_W, CNN_FC_IN), np.float32)
    for t in range(POOL_LEN):
        w_even[(2 * t) * KC:(2 * t + 1) * KC, t * C1_OUT:(t + 1) * C1_OUT] = w_c1f
        w_odd[(2 * t + 1) * KC:(2 * t + 2) * KC, t * C1_OUT:(t + 1) * C1_OUT] = w_c1f

    # Conv1d(8,8,1) as a block-diagonal (120, 120) matmul.
    w_c2_k = np.asarray(p["w2"])[:, :, 0].T                      # (c_in, c_out)
    w_c2_big = np.zeros((CNN_FC_IN, CNN_FC_IN), np.float32)
    for t in range(POOL_LEN):
        w_c2_big[t * C1_OUT:(t + 1) * C1_OUT, t * C1_OUT:(t + 1) * C1_OUT] = w_c2_k

    # Linear(120,64) in (t, channel) row order (PyTorch flattens (channel, t)),
    # then fused with the cnn half of the final Linear(96, 4).
    wfc1_tc = np.transpose(
        np.asarray(p["wfc1"]).T.reshape(C1_OUT, POOL_LEN, CNN_FC_OUT),
        (1, 0, 2)).reshape(CNN_FC_IN, CNN_FC_OUT)
    w_out = np.asarray(p["wout"])                                # (4, 96)
    w_out_l = w_out[:, :H].T                                     # (H, 4)
    w_out_c = w_out[:, H:].T                                     # (64, 4)
    w_cnn = wfc1_tc @ w_out_c                                    # (120, 4)
    b_out = (np.asarray(p["bout"])
             + np.asarray(p["bfc1"]) @ w_out_c).reshape(1, OUT_DIM)

    return dict(
        w_ih=jnp.asarray(np.asarray(p["w_ih"]).T),               # (D, 4H)
        w_hh=jnp.asarray(np.asarray(p["w_hh"]).T),               # (H, 4H)
        b_lstm=jnp.asarray((np.asarray(p["b_ih"])
                            + np.asarray(p["b_hh"])).reshape(1, 4 * H)),
        w_pool_even=jnp.asarray(w_even),
        w_pool_odd=jnp.asarray(w_odd),
        b_c1=jnp.asarray(np.tile(np.asarray(p["b1"]), POOL_LEN).reshape(1, CNN_FC_IN)),
        w_c2=jnp.asarray(w_c2_big),
        b_c2=jnp.asarray(np.tile(np.asarray(p["b2"]), POOL_LEN).reshape(1, CNN_FC_IN)),
        w_cnn=jnp.asarray(w_cnn),
        w_out_l=jnp.asarray(w_out_l),
        b_out=jnp.asarray(b_out),
    )


# ----------------------------------------------------------------------------
# Pure-JAX reference with PyTorch semantics / PyTorch-shaped params.
# ----------------------------------------------------------------------------
def reference_forward(lstm_input, cnn_input, p):
    B = lstm_input.shape[0]
    H = LSTM_HIDDEN
    h = jnp.zeros((B, H), jnp.float32)
    c = jnp.zeros((B, H), jnp.float32)
    bias = p["b_ih"] + p["b_hh"]
    lstm_out = None
    for t in range(lstm_input.shape[1]):
        g = lstm_input[:, t, :] @ p["w_ih"].T + h @ p["w_hh"].T + bias
        i_g = jax.nn.sigmoid(g[:, :H])
        f_g = jax.nn.sigmoid(g[:, H:2 * H])
        g_g = jnp.tanh(g[:, 2 * H:3 * H])
        o_g = jax.nn.sigmoid(g[:, 3 * H:])
        c = f_g * c + i_g * g_g
        h = o_g * jnp.tanh(c)
        if t == 3:
            lstm_out = h

    x = cnn_input.astype(jnp.float32)                            # (B, C, L)
    conv = jnp.stack(
        [jnp.einsum("bck,ock->bo", x[:, :, q:q + CONV_K], p["w1"])
         for q in range(CONV_OUT_LEN)], axis=2)                  # (B, 8, 31)
    r = jnp.maximum(conv + p["b1"][None, :, None], 0.0)
    pooled = jnp.max(r[:, :, :POOL_POS].reshape(B, C1_OUT, POOL_LEN, 2), axis=3)
    z = jnp.maximum(jnp.einsum("bct,oc->bot", pooled, p["w2"][:, :, 0])
                    + p["b2"][None, :, None], 0.0)               # (B, 8, 15)
    flat = z.reshape(B, CNN_FC_IN)                               # (channel, t) order
    cnn_out = flat @ p["wfc1"].T + p["bfc1"]
    concat = jnp.concatenate([lstm_out, cnn_out], axis=1)
    return concat @ p["wout"].T + p["bout"]


if __name__ == "__main__":
    key = jax.random.PRNGKey(0)
    k_lstm, k_cnn, k_params = jax.random.split(key, 3)
    lstm_input = jax.random.normal(k_lstm, (BATCH, SEQ_LEN, LSTM_INPUT), jnp.float32)
    cnn_input = jax.random.normal(k_cnn, (BATCH, CNN_CIN, CNN_LEN), jnp.float32)

    params_pt = init_params(k_params)
    kparams = prepare_kernel_params(params_pt)

    out = cnn_lstm_mix_forward(lstm_input, cnn_input, kparams)
    out = jax.block_until_ready(out)

    ref = reference_forward(lstm_input, cnn_input, params_pt)
    assert out.shape == (BATCH, OUT_DIM)
    np.testing.assert_allclose(np.asarray(out), np.asarray(ref), rtol=2e-2, atol=2e-2)
    print("KERNEL_OK")
</pallas_src>

<mosaic_0001>
module attributes {stable_mosaic.version = 11 : i64} {
  func.func @cnn_lstm_kernel(%arg0: memref<8x16xf32, #tpu.memory_space<vmem>>, %arg1: memref<2x1200xf32, #tpu.memory_space<vmem>>, %arg2: memref<16x128xf32, #tpu.memory_space<vmem>>, %arg3: memref<32x128xf32, #tpu.memory_space<vmem>>, %arg4: memref<1x128xf32, #tpu.memory_space<vmem>>, %arg5: memref<1200x120xf32, #tpu.memory_space<vmem>>, %arg6: memref<1200x120xf32, #tpu.memory_space<vmem>>, %arg7: memref<1x120xf32, #tpu.memory_space<vmem>>, %arg8: memref<120x120xf32, #tpu.memory_space<vmem>>, %arg9: memref<1x120xf32, #tpu.memory_space<vmem>>, %arg10: memref<120x4xf32, #tpu.memory_space<vmem>>, %arg11: memref<32x4xf32, #tpu.memory_space<vmem>>, %arg12: memref<1x4xf32, #tpu.memory_space<vmem>>, %arg13: memref<2x4xf32, #tpu.memory_space<vmem>>) attributes {dimension_semantics = [], scalar_prefetch = 0 : i64, scratch_operands = 0 : i64, tpu.core_type = #tpu.core_type<tc>} {
    %c0 = arith.constant 0 : index
    %c0_0 = arith.constant 0 : index
    %0 = vector.load %arg0[%c0, %c0_0] : memref<8x16xf32, #tpu.memory_space<vmem>>, vector<8x16xf32>
    %c0_1 = arith.constant 0 : index
    %c0_2 = arith.constant 0 : index
    %1 = vector.load %arg2[%c0_1, %c0_2] : memref<16x128xf32, #tpu.memory_space<vmem>>, vector<16x128xf32>
    %cst = arith.constant dense<0.000000e+00> : vector<8x128xf32>
    %2 = tpu.matmul %0, %1, %cst {dimension_numbers = #tpu.dot_dimension_numbers<[1], [0], [0], [1], [0, 0, 1, 1], [], []>} : vector<8x16xf32>, vector<16x128xf32>, vector<8x128xf32> -> vector<8x128xf32>
    %c0_3 = arith.constant 0 : index
    %c0_4 = arith.constant 0 : index
    %3 = vector.load %arg4[%c0_3, %c0_4] : memref<1x128xf32, #tpu.memory_space<vmem>>, vector<1x128xf32>
    %4 = vector.broadcast %3 : vector<1x128xf32> to vector<8x128xf32>
    %5 = arith.addf %2, %4 : vector<8x128xf32>
    %c0_5 = arith.constant 0 : index
    %c0_6 = arith.constant 0 : index
    %6 = vector.load %arg3[%c0_5, %c0_6] : memref<32x128xf32, #tpu.memory_space<vmem>>, vector<32x128xf32>
    %7 = vector.extract_strided_slice %5 {offsets = [0, 0], sizes = [2, 128], strides = [1, 1]} : vector<8x128xf32> to vector<2x128xf32>
    %cst_7 = arith.constant 0.000000e+00 : f32
    %8 = vector.broadcast %cst_7 : f32 to vector<2x32xf32>
    %cst_8 = arith.constant 0.000000e+00 : f32
    %9 = vector.broadcast %cst_8 : f32 to vector<2x128xf32>
    %10 = arith.subf %9, %7 : vector<2x128xf32>
    %11 = math.exp %10 : vector<2x128xf32>
    %cst_9 = arith.constant 1.000000e+00 : f32
    %12 = vector.broadcast %cst_9 : f32 to vector<2x128xf32>
    %13 = arith.addf %12, %11 : vector<2x128xf32>
    %14 = tpu.reciprocal %13 {approx = true} : vector<2x128xf32> -> vector<2x128xf32>
    %15 = math.tanh %7 : vector<2x128xf32>
    %16 = vector.extract_strided_slice %14 {offsets = [0, 32], sizes = [2, 32], strides = [1, 1]} : vector<2x128xf32> to vector<2x32xf32>
    %17 = arith.mulf %16, %8 : vector<2x32xf32>
    %18 = vector.extract_strided_slice %14 {offsets = [0, 0], sizes = [2, 32], strides = [1, 1]} : vector<2x128xf32> to vector<2x32xf32>
    %19 = vector.extract_strided_slice %15 {offsets = [0, 64], sizes = [2, 32], strides = [1, 1]} : vector<2x128xf32> to vector<2x32xf32>
    %20 = arith.mulf %18, %19 : vector<2x32xf32>
    %21 = arith.addf %17, %20 : vector<2x32xf32>
    %22 = vector.extract_strided_slice %14 {offsets = [0, 96], sizes = [2, 32], strides = [1, 1]} : vector<2x128xf32> to vector<2x32xf32>
    %23 = math.tanh %21 : vector<2x32xf32>
    %24 = arith.mulf %22, %23 : vector<2x32xf32>
    %25 = vector.extract_strided_slice %5 {offsets = [2, 0], sizes = [2, 128], strides = [1, 1]} : vector<8x128xf32> to vector<2x128xf32>
    %cst_10 = arith.constant dense<0.000000e+00> : vector<2x128xf32>
    %26 = tpu.matmul %24, %6, %cst_10 {dimension_numbers = #tpu.dot_dimension_numbers<[1], [0], [0], [1], [0, 0, 1, 1], [], []>} : vector<2x32xf32>, vector<32x128xf32>, vector<2x128xf32> -> vector<2x128xf32>
    %27 = arith.addf %25, %26 : vector<2x128xf32>
    %cst_11 = arith.constant 0.000000e+00 : f32
    %28 = vector.broadcast %cst_11 : f32 to vector<2x128xf32>
    %29 = arith.subf %28, %27 : vector<2x128xf32>
    %30 = math.exp %29 : vector<2x128xf32>
    %cst_12 = arith.constant 1.000000e+00 : f32
    %31 = vector.broadcast %cst_12 : f32 to vector<2x128xf32>
    %32 = arith.addf %31, %30 : vector<2x128xf32>
    %33 = tpu.reciprocal %32 {approx = true} : vector<2x128xf32> -> vector<2x128xf32>
    %34 = math.tanh %27 : vector<2x128xf32>
    %35 = vector.extract_strided_slice %33 {offsets = [0, 32], sizes = [2, 32], strides = [1, 1]} : vector<2x128xf32> to vector<2x32xf32>
    %36 = arith.mulf %35, %21 : vector<2x32xf32>
    %37 = vector.extract_strided_slice %33 {offsets = [0, 0], sizes = [2, 32], strides = [1, 1]} : vector<2x128xf32> to vector<2x32xf32>
    %38 = vector.extract_strided_slice %34 {offsets = [0, 64], sizes = [2, 32], strides = [1, 1]} : vector<2x128xf32> to vector<2x32xf32>
    %39 = arith.mulf %37, %38 : vector<2x32xf32>
    %40 = arith.addf %36, %39 : vector<2x32xf32>
    %41 = vector.extract_strided_slice %33 {offsets = [0, 96], sizes = [2, 32], strides = [1, 1]} : vector<2x128xf32> to vector<2x32xf32>
    %42 = math.tanh %40 : vector<2x32xf32>
    %43 = arith.mulf %41, %42 : vector<2x32xf32>
    %44 = vector.extract_strided_slice %5 {offsets = [4, 0], sizes = [2, 128], strides = [1, 1]} : vector<8x128xf32> to vector<2x128xf32>
    %cst_13 = arith.constant dense<0.000000e+00> : vector<2x128xf32>
    %45 = tpu.matmul %43, %6, %cst_13 {dimension_numbers = #tpu.dot_dimension_numbers<[1], [0], [0], [1], [0, 0, 1, 1], [], []>} : vector<2x32xf32>, vector<32x128xf32>, vector<2x128xf32> -> vector<2x128xf32>
    %46 = arith.addf %44, %45 : vector<2x128xf32>
    %cst_14 = arith.constant 0.000000e+00 : f32
    %47 = vector.broadcast %cst_14 : f32 to vector<2x128xf32>
    %48 = arith.subf %47, %46 : vector<2x128xf32>
    %49 = math.exp %48 : vector<2x128xf32>
    %cst_15 = arith.constant 1.000000e+00 : f32
    %50 = vector.broadcast %cst_15 : f32 to vector<2x128xf32>
    %51 = arith.addf %50, %49 : vector<2x128xf32>
    %52 = tpu.reciprocal %51 {approx = true} : vector<2x128xf32> -> vector<2x128xf32>
    %53 = math.tanh %46 : vector<2x128xf32>
    %54 = vector.extract_strided_slice %52 {offsets = [0, 32], sizes = [2, 32], strides = [1, 1]} : vector<2x128xf32> to vector<2x32xf32>
    %55 = arith.mulf %54, %40 : vector<2x32xf32>
    %56 = vector.extract_strided_slice %52 {offsets = [0, 0], sizes = [2, 32], strides = [1, 1]} : vector<2x128xf32> to vector<2x32xf32>
    %57 = vector.extract_strided_slice %53 {offsets = [0, 64], sizes = [2, 32], strides = [1, 1]} : vector<2x128xf32> to vector<2x32xf32>
    %58 = arith.mulf %56, %57 : vector<2x32xf32>
    %59 = arith.addf %55, %58 : vector<2x32xf32>
    %60 = vector.extract_strided_slice %52 {offsets = [0, 96], sizes = [2, 32], strides = [1, 1]} : vector<2x128xf32> to vector<2x32xf32>
    %61 = math.tanh %59 : vector<2x32xf32>
    %62 = arith.mulf %60, %61 : vector<2x32xf32>
    %63 = vector.extract_strided_slice %5 {offsets = [6, 0], sizes = [2, 128], strides = [1, 1]} : vector<8x128xf32> to vector<2x128xf32>
    %cst_16 = arith.constant dense<0.000000e+00> : vector<2x128xf32>
    %64 = tpu.matmul %62, %6, %cst_16 {dimension_numbers = #tpu.dot_dimension_numbers<[1], [0], [0], [1], [0, 0, 1, 1], [], []>} : vector<2x32xf32>, vector<32x128xf32>, vector<2x128xf32> -> vector<2x128xf32>
    %65 = arith.addf %63, %64 : vector<2x128xf32>
    %cst_17 = arith.constant 0.000000e+00 : f32
    %66 = vector.broadcast %cst_17 : f32 to vector<2x128xf32>
    %67 = arith.subf %66, %65 : vector<2x128xf32>
    %68 = math.exp %67 : vector<2x128xf32>
    %cst_18 = arith.constant 1.000000e+00 : f32
    %69 = vector.broadcast %cst_18 : f32 to vector<2x128xf32>
    %70 = arith.addf %69, %68 : vector<2x128xf32>
    %71 = tpu.reciprocal %70 {approx = true} : vector<2x128xf32> -> vector<2x128xf32>
    %72 = math.tanh %65 : vector<2x128xf32>
    %73 = vector.extract_strided_slice %71 {offsets = [0, 32], sizes = [2, 32], strides = [1, 1]} : vector<2x128xf32> to vector<2x32xf32>
    %74 = arith.mulf %73, %59 : vector<2x32xf32>
    %75 = vector.extract_strided_slice %71 {offsets = [0, 0], sizes = [2, 32], strides = [1, 1]} : vector<2x128xf32> to vector<2x32xf32>
    %76 = vector.extract_strided_slice %72 {offsets = [0, 64], sizes = [2, 32], strides = [1, 1]} : vector<2x128xf32> to vector<2x32xf32>
    %77 = arith.mulf %75, %76 : vector<2x32xf32>
    %78 = arith.addf %74, %77 : vector<2x32xf32>
    %79 = vector.extract_strided_slice %71 {offsets = [0, 96], sizes = [2, 32], strides = [1, 1]} : vector<2x128xf32> to vector<2x32xf32>
    %80 = math.tanh %78 : vector<2x32xf32>
    %81 = arith.mulf %79, %80 : vector<2x32xf32>
    %c0_19 = arith.constant 0 : index
    %c0_20 = arith.constant 0 : index
    %82 = vector.load %arg1[%c0_19, %c0_20] : memref<2x1200xf32, #tpu.memory_space<vmem>>, vector<2x1200xf32>
    %c0_21 = arith.constant 0 : index
    %c0_22 = arith.constant 0 : index
    %83 = vector.load %arg5[%c0_21, %c0_22] : memref<1200x120xf32, #tpu.memory_space<vmem>>, vector<1200x120xf32>
    %cst_23 = arith.constant dense<0.000000e+00> : vector<2x120xf32>
    %84 = tpu.matmul %82, %83, %cst_23 {dimension_numbers = #tpu.dot_dimension_numbers<[1], [0], [0], [1], [0, 0, 1, 1], [], []>} : vector<2x1200xf32>, vector<1200x120xf32>, vector<2x120xf32> -> vector<2x120xf32>
    %c0_24 = arith.constant 0 : index
    %c0_25 = arith.constant 0 : index
    %85 = vector.load %arg6[%c0_24, %c0_25] : memref<1200x120xf32, #tpu.memory_space<vmem>>, vector<1200x120xf32>
    %cst_26 = arith.constant dense<0.000000e+00> : vector<2x120xf32>
    %86 = tpu.matmul %82, %85, %cst_26 {dimension_numbers = #tpu.dot_dimension_numbers<[1], [0], [0], [1], [0, 0, 1, 1], [], []>} : vector<2x1200xf32>, vector<1200x120xf32>, vector<2x120xf32> -> vector<2x120xf32>
    %87 = arith.maximumf %84, %86 : vector<2x120xf32>
    %c0_27 = arith.constant 0 : index
    %c0_28 = arith.constant 0 : index
    %88 = vector.load %arg7[%c0_27, %c0_28] : memref<1x120xf32, #tpu.memory_space<vmem>>, vector<1x120xf32>
    %89 = vector.broadcast %88 : vector<1x120xf32> to vector<2x120xf32>
    %90 = arith.addf %87, %89 : vector<2x120xf32>
    %cst_29 = arith.constant 0.000000e+00 : f32
    %91 = vector.broadcast %cst_29 : f32 to vector<2x120xf32>
    %92 = arith.maximumf %90, %91 : vector<2x120xf32>
    %c0_30 = arith.constant 0 : index
    %c0_31 = arith.constant 0 : index
    %93 = vector.load %arg8[%c0_30, %c0_31] : memref<120x120xf32, #tpu.memory_space<vmem>>, vector<120x120xf32>
    %cst_32 = arith.constant dense<0.000000e+00> : vector<2x120xf32>
    %94 = tpu.matmul %92, %93, %cst_32 {dimension_numbers = #tpu.dot_dimension_numbers<[1], [0], [0], [1], [0, 0, 1, 1], [], []>} : vector<2x120xf32>, vector<120x120xf32>, vector<2x120xf32> -> vector<2x120xf32>
    %c0_33 = arith.constant 0 : index
    %c0_34 = arith.constant 0 : index
    %95 = vector.load %arg9[%c0_33, %c0_34] : memref<1x120xf32, #tpu.memory_space<vmem>>, vector<1x120xf32>
    %96 = vector.broadcast %95 : vector<1x120xf32> to vector<2x120xf32>
    %97 = arith.addf %94, %96 : vector<2x120xf32>
    %cst_35 = arith.constant 0.000000e+00 : f32
    %98 = vector.broadcast %cst_35 : f32 to vector<2x120xf32>
    %99 = arith.maximumf %97, %98 : vector<2x120xf32>
    %c0_36 = arith.constant 0 : index
    %c0_37 = arith.constant 0 : index
    %100 = vector.load %arg11[%c0_36, %c0_37] : memref<32x4xf32, #tpu.memory_space<vmem>>, vector<32x4xf32>
    %cst_38 = arith.constant dense<0.000000e+00> : vector<2x4xf32>
    %101 = tpu.matmul %81, %100, %cst_38 {dimension_numbers = #tpu.dot_dimension_numbers<[1], [0], [0], [1], [0, 0, 1, 1], [], []>} : vector<2x32xf32>, vector<32x4xf32>, vector<2x4xf32> -> vector<2x4xf32>
    %c0_39 = arith.constant 0 : index
    %c0_40 = arith.constant 0 : index
    %102 = vector.load %arg10[%c0_39, %c0_40] : memref<120x4xf32, #tpu.memory_space<vmem>>, vector<120x4xf32>
    %cst_41 = arith.constant dense<0.000000e+00> : vector<2x4xf32>
    %103 = tpu.matmul %99, %102, %cst_41 {dimension_numbers = #tpu.dot_dimension_numbers<[1], [0], [0], [1], [0, 0, 1, 1], [], []>} : vector<2x120xf32>, vector<120x4xf32>, vector<2x4xf32> -> vector<2x4xf32>
    %104 = arith.addf %101, %103 : vector<2x4xf32>
    %c0_42 = arith.constant 0 : index
    %c0_43 = arith.constant 0 : index
    %105 = vector.load %arg12[%c0_42, %c0_43] : memref<1x4xf32, #tpu.memory_space<vmem>>, vector<1x4xf32>
    %106 = vector.broadcast %105 : vector<1x4xf32> to vector<2x4xf32>
    %107 = arith.addf %104, %106 : vector<2x4xf32>
    %c0_44 = arith.constant 0 : index
    %c0_45 = arith.constant 0 : index
    %108 = vector.load %arg13[%c0_44, %c0_45] : memref<2x4xf32, #tpu.memory_space<vmem>>, vector<2x4xf32>
    tpu.vector_store %arg13[%c0_44, %c0_45], %107 {strides = array<i32>} : memref<2x4xf32, #tpu.memory_space<vmem>>, vector<2x4xf32>,
    return
  }
}

</mosaic_0001>

<bundles_post_ra>
// kernel: tpu_custom_call.1
= control target key start
LH: loop header
LB: loop body
LE: loop exit
PB: predicated region body
PF: predicated region fallthrough
CT: control target
= control target key end

     0   :  { %18 = vsyncpa [#allocation3], 0  ;;  %s3411_s0 = inlined_call_operand.hbm [shape: f32[8,16], index: 0, kind: input, shape index: {}]   ;;  %s3412_s1 = inlined_call_operand.vmem [shape: f32[2,1200], index: 1, kind: input, shape index: {}]   ;;  %s3413_s2 = inlined_call_operand.vmem [shape: f32[16,128], index: 2, kind: input, shape index: {}]   ;;  %s3414_s3 = inlined_call_operand.vmem [shape: f32[32,128], index: 3, kind: input, shape index: {}]   ;;  %s3415_s4 = inlined_call_operand.vmem [shape: f32[1,128], index: 4, kind: input, shape index: {}]   ;;  %s3416_s5 = inlined_call_operand.hbm [shape: f32[1200,120], index: 5, kind: input, shape index: {}]   ;;  %s3417_s6 = inlined_call_operand.hbm [shape: f32[1200,120], index: 6, kind: input, shape index: {}]   ;;  %s3418_s7 = inlined_call_operand.hbm [shape: f32[1,120], index: 7, kind: input, shape index: {}]   ;;  %s3419_s8 = inlined_call_operand.vmem [shape: f32[120,120], index: 8, kind: input, shape index: {}]   ;;  %s3420_s9 = inlined_call_operand.hbm [shape: f32[1,120], index: 9, kind: input, shape index: {}]   ;;  %s3421_s10 = inlined_call_operand.vmem [shape: f32[120,4], index: 10, kind: input, shape index: {}]   ;;  %s3422_s11 = inlined_call_operand.vmem [shape: f32[32,4], index: 11, kind: input, shape index: {}]   ;;  %s3423_s12 = inlined_call_operand.vmem [shape: f32[1,4], index: 12, kind: input, shape index: {}]   ;;  %s3424_s13 = inlined_call_operand.hbm [shape: f32[2,4], index: 13, kind: output, shape index: {}]  }
   0x1   :  { %19 = vsyncpa [#allocation6], 0 }
   0x2   :  { %20 = vsyncpa [#allocation9], 0 }
   0x3   :  { %21 = vsyncpa [#allocation4], 0  ;;  %s2943_s25 = smov [#allocation5]   ;;  %s2803_s29 = scalar_lea.hbm %s3416_s5, 19200 }
   0x4   :  { %s45_s26 = sshll.u32 %s2943_s25, 4  ;;  %p2804_p0 = scmp.ne.s32.totalorder %s3416_s5, %s2803_s29  ;;  %s46_s26 = int_to_ptr.vmem [resolvable:$true] %s45_s26 }
   0x5   :  { %p2807_p1 = scmp.lt.u32.totalorder %s2803_s29, %s3416_s5 }
   0x7   :  { %p2809_p2 = pnand %p2807_p1, %p2804_p0 }
   0x9   :  { %2812 = shalt.err (!%p2809_p2)
}
   0xa   :  { %s2813_s17 = scalar_lea.vmem %s46_s26, 19200  ;;  %p2818_p4 = scmp.lt.s32.totalorder %s46_s26, %s46_s26 }
   0xb   :  { %p2814_p3 = scmp.ne.s32.totalorder %s46_s26, %s2813_s17  ;;  %p2819_p5 = scmp.lt.s32.totalorder %s2813_s17, %s2813_s17 }
   0xd   :  { %p2820_p6 = por %p2819_p5, %p2818_p4 }
   0xf   :  { %p2821_p7 = pnand %p2820_p6, %p2814_p3 }
  0x11   :  { %2824 = shalt.err (!%p2821_p7)
}
  0x12   :  { %s2944_s18 = smov 128   ;;  %s2945_s19 = smov 8  }
  0x13   :  { %51 = dma.hbm_to_vmem [thread:$0]  %s3416_s5, 19200, %s46_s26, [#allocation6], %s2944_s18, %s2944_s18, %s2945_s19  }
  0x14   :  { %s2946_s22 = smov [#allocation8]   ;;  %s2947_s24 = smov [#allocation2]  }
  0x15   :  { %s70_s23 = sshll.u32 %s2946_s22, 4  ;;  %s28_s25 = sshll.u32 %s2947_s24, 4  ;;  %s71_s23 = int_to_ptr.vmem [resolvable:$true] %s70_s23  ;;  %s29_s25 = int_to_ptr.vmem [resolvable:$true] %s28_s25 }
  0x16   :  { %s2825_s29 = scalar_lea.hbm %s3418_s7, 16 }
  0x17   :  { %p2826_p8 = scmp.ne.s32.totalorder %s3418_s7, %s2825_s29  ;;  %p2829_p9 = scmp.lt.u32.totalorder %s2825_s29, %s3418_s7 }
  0x19   :  { %p2831_p10 = pnand %p2829_p9, %p2826_p8 }
  0x1b   :  { %2834 = shalt.err (!%p2831_p10)
}
  0x1c   :  { %s2835_s5 = scalar_lea.vmem %s71_s23, 16  ;;  %s2839_s26 = scalar_lea.vmem %s71_s23, 32 }
  0x1d   :  { %p2836_p11 = scmp.ne.s32.totalorder %s71_s23, %s2835_s5  ;;  %p2840_p12 = scmp.lt.s32.totalorder %s71_s23, %s71_s23 }
  0x1e   :  { %p2841_p13 = scmp.lt.s32.totalorder %s2839_s26, %s2835_s5 }
  0x20   :  { %p2842_p0 = por %p2841_p13, %p2840_p12 }
  0x22   :  { %p2843_p1 = pnand %p2842_p0, %p2836_p11 }
  0x24   :  { %2846 = shalt.err (!%p2843_p1)
}
  0x25   :  { %73 = dma.hbm_to_vmem [thread:$0]  %s3418_s7, 16, %s71_s23, [#allocation9]  }
  0x26   :  { %s2847_s24 = scalar_lea.hbm %s3411_s0, 128 }
  0x27   :  { %p2848_p2 = scmp.ne.s32.totalorder %s3411_s0, %s2847_s24  ;;  %p2851_p3 = scmp.lt.u32.totalorder %s2847_s24, %s3411_s0 }
  0x29   :  { %p2853_p4 = pnand %p2851_p3, %p2848_p2 }
  0x2b   :  { %2856 = shalt.err (!%p2853_p4)
}
  0x2c   :  { %s2857_s14 = scalar_lea.vmem %s29_s25, 128  ;;  %p2862_p6 = scmp.lt.s32.totalorder %s29_s25, %s29_s25 }
  0x2d   :  { %p2858_p5 = scmp.ne.s32.totalorder %s29_s25, %s2857_s14  ;;  %p2863_p7 = scmp.lt.s32.totalorder %s2857_s14, %s2857_s14 }
  0x2f   :  { %p2864_p8 = por %p2863_p7, %p2862_p6 }
  0x31   :  { %p2865_p9 = pnand %p2864_p8, %p2858_p5 }
  0x33   :  { %2868 = shalt.err (!%p2865_p9)
}
  0x34   :  { %31 = dma.hbm_to_vmem [thread:$0]  %s3411_s0, 128, %s29_s25, [#allocation3]  }
  0x35   :  { %s2948_s15 = smov [#allocation7]   ;;  %s2949_s5 = smov [#allocation10]  }
  0x36   :  { %s57_s16 = sshll.u32 %s2948_s15, 4  ;;  %s82_s26 = sshll.u32 %s2949_s5, 4  ;;  %s58_s16 = int_to_ptr.vmem [resolvable:$true] %s57_s16  ;;  %s83_s26 = int_to_ptr.vmem [resolvable:$true] %s82_s26 }
  0x37   :  { %s2869_s21 = scalar_lea.hbm %s3417_s6, 19200 }
  0x38   :  { %p2870_p10 = scmp.ne.s32.totalorder %s3417_s6, %s2869_s21  ;;  %p2873_p11 = scmp.lt.u32.totalorder %s2869_s21, %s3417_s6 }
  0x3a   :  { %p2875_p12 = pnand %p2873_p11, %p2870_p10 }
  0x3c   :  { %2878 = shalt.err (!%p2875_p12)
}
  0x3d   :  { %s2879_s0 = scalar_lea.vmem %s58_s16, 19200  ;;  %p2884_p0 = scmp.lt.s32.totalorder %s58_s16, %s58_s16 }
  0x3e   :  { %p2880_p13 = scmp.ne.s32.totalorder %s58_s16, %s2879_s0  ;;  %p2885_p1 = scmp.lt.s32.totalorder %s2879_s0, %s2879_s0 }
  0x40   :  { %p2886_p2 = por %p2885_p1, %p2884_p0 }
  0x42   :  { %p2887_p3 = pnand %p2886_p2, %p2880_p13 }
  0x44   :  { %2890 = shalt.err (!%p2887_p3)
}
  0x45   :  { %63 = dma.hbm_to_vmem [thread:$0]  %s3417_s6, 19200, %s58_s16, [#allocation6], %s2944_s18, %s2944_s18, %s2945_s19  }
  0x46   :  { %s2891_s7 = scalar_lea.hbm %s3420_s9, 16 }
  0x47   :  { %p2892_p4 = scmp.ne.s32.totalorder %s3420_s9, %s2891_s7  ;;  %p2895_p5 = scmp.lt.u32.totalorder %s2891_s7, %s3420_s9 }
  0x49   :  { %p2897_p6 = pnand %p2895_p5, %p2892_p4 }
  0x4b   :  { %2900 = shalt.err (!%p2897_p6)
}
  0x4c   :  { %s2901_s20 = scalar_lea.vmem %s83_s26, 16  ;;  %s2905_s21 = scalar_lea.vmem %s83_s26, 32 }
  0x4d   :  { %p2902_p7 = scmp.ne.s32.totalorder %s83_s26, %s2901_s20  ;;  %p2906_p8 = scmp.lt.s32.totalorder %s83_s26, %s83_s26 }
  0x4e   :  { %p2907_p9 = scmp.lt.s32.totalorder %s2905_s21, %s2901_s20 }
  0x50   :  { %p2908_p10 = por %p2907_p9, %p2906_p8 }
  0x52   :  { %p2909_p11 = pnand %p2908_p10, %p2902_p7 }
  0x54   :  { %2912 = shalt.err (!%p2909_p11)
}
  0x55   :  { %85 = dma.hbm_to_vmem [thread:$0]  %s3420_s9, 16, %s83_s26, [#allocation9]  }
  0x56   :  { %2935 = dma.done.wait [#allocation3], 128  }
  0x57   :  { %2936 = vsyncadd [#allocation3], 4294967168 }
  0x58   :  { %2937 = dma.done.wait [#allocation6], 38400  }
  0x59   :  { %2938 = vsyncadd [#allocation6], 4294928896 }
  0x5a   :  { %2939 = dma.done.wait [#allocation9], 32  }
  0x5b   :  { %2940 = vsyncadd [#allocation9], 4294967264  ;;  %v2950_v0 = vmov 0.0|0.0   ;;  %vm2951_vm0 = vmmov 0   ;;  %v2952_v1 = vmov 0.0   ;;  %v108_v2 = vld [vmem:[%s3413_s2] sm:$0xff] }
  0x5c   :  { %2364 = vmatprep.subr.bf16.mxu1 %v2950_v0  ;;  %2251 = vmatprep.mubr.msk.f32.mxu1 %vm2951_vm0, %v2952_v1  ;;  %v109_v3 = vld [vmem:[%s3413_s2 + $0x8] sm:$0xff]  ;;  %v107_v5 = vld [vmem:[#allocation2] sm:$0xff]  ;;  %vm117_vm1 = vcmask 130048   ;;  %s2953_s2 = smov 64   ;;  %v193_v23 = vld [vmem:[%s3414_s3 + $0x10] sm:$0xff]  ;;  %vm221_vm2 = vcmask 261120  }
  0x5d   :  { %2373 = vmatprep.subr.bf16.mxu0 %v2950_v0  ;;  %2273 = vmatprep.mubr.msk.f32.mxu0 %vm2951_vm0, %v2952_v1  ;;  %v2365_v4 = vpack.c.bf16 %v109_v3, %v108_v2  ;;  %v1898_v6 = vld [vmem:[%s3415_s4] ss:$0 sm:$0xff]  ;;  %s2954_s4 = smov 32   ;;  %v192_v22 = vld [vmem:[%s3414_s3 + $0x8] sm:$0xff]  ;;  %v194_v25 = vld [vmem:[%s3414_s3 + $0x18] sm:$0xff]  ;;  %vm743_vm3 = vcmask 392192  }
  0x5e   :  { %v191_v21 = vld [vmem:[%s3414_s3] sm:$0xff]  ;;  %v2371_v26 = vpack.c.bf16 %v194_v25, %v193_v23  ;;  %v544_v23 = vld [vmem:[#allocation5 + $0x28] sm:$0xff]  ;;  %vm1628_vm4 = vcmask 982016   ;;  %vm1879_vm5 = vcmask 25600  }
  0x5f   :  { %2366 = vmatpush3.bf16.msra.mxu1 %v2365_v4  ;;  %v2368_v24 = vpack.c.bf16 %v192_v22, %v191_v21  ;;  %v543_v22 = vld [vmem:[#allocation5 + $0x20] sm:$0xff]  ;;  %v562_v25 = vld [vmem:[#allocation5 + $0xb8] sm:$0xff] }
  0x60   :  { %2367 = vmatprep.subr.bf16.mxu1 %v2950_v0 }
  0x61   :  { %2375 = vmatpush3.bf16.msra.mxu0 %v2368_v24 }
  0x62   :  { %2252 = vmatmul.mubr.msk.f32.vlgmr.msra.gmra.mrb[0].mxu1 %vm117_vm1, %v107_v5  ;;  %2376 = vmatprep.subr.bf16.mxu0 %v2950_v0 }
  0x63   :  { %2262 = vmatprep.mubr.msk.f32.mxu1 %vm2951_vm0, %v2952_v1  ;;  %2369 = vmatpush3.bf16.msra.mxu1 %v2368_v24 }
  0x64   :  { %2370 = vmatprep.subr.bf16.mxu1 %v2950_v0 }
  0x65   :  { %2378 = vmatpush3.bf16.msra.mxu0 %v2371_v26 }
  0x67   :  { %2372 = vmatpush3.bf16.msra.mxu1 %v2371_v26 }
  0x68   :  { %2379 = vmatprep.subr.bf16.mxu1 %v2950_v0 }
 0x135   :  { %v187_v7 = vpop.f32.mrb[0].mxu1 }
 0x136   :  { %v3111_v8 = vadd.f32 %v1898_v6, %v187_v7  ;;  %v2253_v9 = vpop.f32.mrb[1].mxu1  ;;  %v555_v6 = vld [vmem:[#allocation5 + $0x80] sm:$0xff]  ;;  %v556_v7 = vld [vmem:[#allocation5 + $0x88] sm:$0xff] }
 0x137   :  { %v539_v9 = vld [vmem:[#allocation5] sm:$0xff] }
 0x138   :  { %2771 = vtanh.f32 %v3111_v8  ;;  %v195_v11 = vsub.f32 0.0, %v3111_v8 }
 0x13a   :  { %v196_v12 = vmul.f32 1.442695, %v195_v11  ;;  %v540_v11 = vld [vmem:[#allocation5 + $0x8] sm:$0xff] }
 0x13c   :  { %2773 = vpow2.f32 %v196_v12  ;;  %v557_v12 = vld [vmem:[#allocation5 + $0x90] sm:$0xff] }
 0x142   :  { %v2772_v10 = vpop.eup %2771 }
 0x143   :  { %203 = vrot.lane.b32.xlu0 %v2772_v10, %s2953_s2  ;;  %v2385_v10 = vpack.c.bf16 %v556_v7, %v555_v6  ;;  %v536_v6 = vld [vmem:[%s3412_s1] sm:$0xff] }
 0x145   :  { %2386 = vmatprep.subr.bf16.mxu0 %v2385_v10  ;;  %v619_v10 = vld [vmem:[#allocation5 + $0x280] sm:$0xff] }
 0x146   :  { %v2774_v13 = vpop.eup %2773 }
 0x147   :  { %v198_v14 = vadd.f32 1.0, %v2774_v13  ;;  %v558_v13 = vld [vmem:[#allocation5 + $0x98] sm:$0xff] }
 0x149   :  { %2775 = vrcp.f32 %v198_v14  ;;  %v2387_v14 = vpack.c.bf16 %v540_v11, %v539_v9 }
 0x153   :  { %v2776_v15 = vpop.eup %2775 }
 0x154   :  { %v201_v18 = vmul.f32 0.0, %v2776_v15 }
 0x1b5   :  { %v204_v16 = vpop.permute.xlu0 %203 }
 0x1b6   :  { %v206_v17 = vmul.f32 %v2776_v15, %v204_v16  ;;  %v541_v16 = vld [vmem:[#allocation5 + $0x10] sm:$0xff] }
 0x1b8   :  { %208 = vrot.lane.b32.xlu0 %v206_v17, %s2954_s4  ;;  %v542_v17 = vld [vmem:[#allocation5 + $0x18] sm:$0xff] }
 0x22a   :  { %v209_v19 = vpop.permute.xlu0 %208 }
 0x22b   :  { %v211_v20 = vadd.f32 %v209_v19, %v201_v18  ;;  %v559_v18 = vld [vmem:[#allocation5 + $0xa0] sm:$0xff]  ;;  %v560_v19 = vld [vmem:[#allocation5 + $0xa8] sm:$0xff] }
 0x22c   :  { %v2393_v21 = vpack.c.bf16 %v560_v19, %v559_v18  ;;  %v622_v18 = vld [vmem:[#allocation5 + $0x298] sm:$0xff]  ;;  %v605_v19 = vld [vmem:[#allocation5 + $0x210] sm:$0xff] }
 0x22d   :  { %2777 = vtanh.f32 %v211_v20  ;;  %v305_v43 = vrot.slane %v211_v20, 6  ;;  %v2391_v20 = vpack.c.bf16 %v542_v17, %v541_v16 }
 0x237   :  { %v2778_v27 = vpop.eup %2777 }
 0x238   :  { %214 = vrot.lane.b32.xlu1 %v2778_v27, %s2953_s2  ;;  %v588_v27 = vld [vmem:[#allocation5 + $0x188] sm:$0xff] }
 0x2aa   :  { %v215_v28 = vpop.permute.xlu1 %214 }
 0x2ab   :  { %v217_v29 = vmul.f32 %v2776_v15, %v215_v28  ;;  %v2389_v15 = vpack.c.bf16 %v558_v13, %v557_v12  ;;  %v620_v13 = vld [vmem:[#allocation5 + $0x288] sm:$0xff] }
 0x2ac   :  { %v2449_v16 = vpack.c.bf16 %v620_v13, %v619_v10  ;;  %v669_v10 = vld [vmem:[#allocation5 + $0x410] sm:$0xff] }
 0x2ad   :  { %219 = vrot.lane.b32.xlu1 %v217_v29, %s2954_s4  ;;  %v2395_v29 = vpack.c.bf16 %v544_v23, %v543_v22  ;;  %v623_v23 = vld [vmem:[#allocation5 + $0x2a0] sm:$0xff] }
 0x31f   :  { %v220_v30 = vpop.permute.xlu1 %219 }
 0x320   :  { %2263 = vmatmul.mubr.msk.f32.vlgmr.msra.gmra.mrb[2].mxu1 %vm221_vm2, %v220_v30 }
 0x321   :  { %2381 = vmatpush3.bf16.msra.mxu1 %v2368_v24  ;;  %2284 = vmatprep.mubr.msk.f32.mxu1 %vm2951_vm0, %v2952_v1  ;;  %v561_v24 = vld [vmem:[#allocation5 + $0xb0] sm:$0xff] }
 0x322   :  { %2382 = vmatprep.subr.bf16.mxu1 %v2950_v0 }
 0x325   :  { %2384 = vmatpush3.bf16.msra.mxu1 %v2371_v26  ;;  %v587_v26 = vld [vmem:[#allocation5 + $0x180] sm:$0xff] }
 0x326   :  { %v2417_v30 = vpack.c.bf16 %v588_v27, %v587_v26  ;;  %v608_v26 = vld [vmem:[#allocation5 + $0x228] sm:$0xff] }
 0x328   :  { %2418 = vmatprep.subr.bf16.mxu1 %v2417_v30  ;;  %v626_v30 = vld [vmem:[#allocation5 + $0x2b8] sm:$0xff] }
 0x3f3   :  { %v290_v31 = vpop.f32.mrb[2].mxu1 }
 0x3f4   :  { %v295_v32 = vrot.slane %v290_v31, 6  ;;  %v2264_v33 = vpop.f32.mrb[3].mxu1  ;;  %v2397_v31 = vpack.c.bf16 %v562_v25, %v561_v24  ;;  %v624_v24 = vld [vmem:[#allocation5 + $0x2a8] sm:$0xff]  ;;  %v607_v25 = vld [vmem:[#allocation5 + $0x220] sm:$0xff] }
 0x3f5   :  { %v546_v33 = vld [vmem:[#allocation5 + $0x38] sm:$0xff]  ;;  %v2457_v27 = vpack.c.bf16 %v624_v24, %v623_v23  ;;  %v677_v24 = vld [vmem:[#allocation5 + $0x450] sm:$0xff] }
 0x3f6   :  { %v297_v34 = vadd.f32 %v295_v32, %v3111_v8  ;;  %v545_v32 = vld [vmem:[#allocation5 + $0x30] sm:$0xff] }
 0x3f8   :  { %2779 = vtanh.f32 %v297_v34  ;;  %v298_v36 = vsub.f32 0.0, %v297_v34  ;;  %v563_v34 = vld [vmem:[#allocation5 + $0xc0] sm:$0xff] }
 0x3fa   :  { %v299_v37 = vmul.f32 1.442695, %v298_v36  ;;  %v2399_v36 = vpack.c.bf16 %v546_v33, %v545_v32  ;;  %v610_v32 = vld [vmem:[#allocation5 + $0x238] sm:$0xff] }
 0x3fc   :  { %2781 = vpow2.f32 %v299_v37 }
 0x402   :  { %v2780_v35 = vpop.eup %2779 }
 0x403   :  { %309 = vrot.lane.b32.xlu0 %v2780_v35, %s2953_s2  ;;  %v564_v35 = vld [vmem:[#allocation5 + $0xc8] sm:$0xff] }
 0x404   :  { %v2401_v37 = vpack.c.bf16 %v564_v35, %v563_v34  ;;  %v627_v35 = vld [vmem:[#allocation5 + $0x2c0] sm:$0xff] }
 0x406   :  { %v2782_v38 = vpop.eup %2781 }
 0x407   :  { %v301_v39 = vadd.f32 1.0, %v2782_v38  ;;  %v547_v38 = vld [vmem:[#allocation5 + $0x40] sm:$0xff] }
 0x409   :  { %2783 = vrcp.f32 %v301_v39  ;;  %v548_v39 = vld [vmem:[#allocation5 + $0x48] sm:$0xff] }
 0x413   :  { %v2784_v40 = vpop.eup %2783 }
 0x414   :  { %v307_v44 = vmul.f32 %v2784_v40, %v305_v43 }
 0x475   :  { %v310_v41 = vpop.permute.xlu0 %309 }
 0x476   :  { %v312_v42 = vmul.f32 %v2784_v40, %v310_v41  ;;  %v565_v41 = vld [vmem:[#allocation5 + $0xd0] sm:$0xff] }
 0x478   :  { %314 = vrot.lane.b32.xlu1 %v312_v42, %s2954_s4  ;;  %v566_v42 = vld [vmem:[#allocation5 + $0xd8] sm:$0xff] }
 0x479   :  { %v2405_v43 = vpack.c.bf16 %v566_v42, %v565_v41 }
 0x4ea   :  { %v315_v45 = vpop.permute.xlu1 %314 }
 0x4eb   :  { %v317_v46 = vadd.f32 %v315_v45, %v307_v44  ;;  %v549_v44 = vld [vmem:[#allocation5 + $0x50] sm:$0xff]  ;;  %v550_v45 = vld [vmem:[#allocation5 + $0x58] sm:$0xff] }
 0x4ed   :  { %2785 = vtanh.f32 %v317_v46  ;;  %v411_v2 = vrot.slane %v317_v46, 6  ;;  %v2407_v46 = vpack.c.bf16 %v550_v45, %v549_v44  ;;  %v630_v44 = vld [vmem:[#allocation5 + $0x2d8] sm:$0xff] }
 0x4f7   :  { %v2786_v47 = vpop.eup %2785 }
 0x4f8   :  { %320 = vrot.lane.b32.xlu0 %v2786_v47, %s2953_s2  ;;  %v567_v47 = vld [vmem:[#allocation5 + $0xe0] sm:$0xff] }
 0x56a   :  { %v321_v48 = vpop.permute.xlu0 %320 }
 0x56b   :  { %v323_v49 = vmul.f32 %v2784_v40, %v321_v48  ;;  %v2403_v40 = vpack.c.bf16 %v548_v39, %v547_v38  ;;  %v568_v48 = vld [vmem:[#allocation5 + $0xe8] sm:$0xff]  ;;  %v611_v38 = vld [vmem:[#allocation5 + $0x240] sm:$0xff] }
 0x56c   :  { %v612_v39 = vld [vmem:[#allocation5 + $0x248] sm:$0xff] }
 0x56d   :  { %v325_v50 = vrot.slane %v323_v49, 2  ;;  %v2409_v49 = vpack.c.bf16 %v568_v48, %v567_v47  ;;  %v2467_v41 = vpack.c.bf16 %v612_v39, %v611_v38  ;;  %v614_v47 = vld [vmem:[#allocation5 + $0x258] sm:$0xff]  ;;  %v687_v38 = vld [vmem:[#allocation5 + $0x4a0] sm:$0xff]  ;;  %v688_v39 = vld [vmem:[#allocation5 + $0x4a8] sm:$0xff] }
 0x56f   :  { %326 = vrot.lane.b32.xlu1 %v325_v50, %s2954_s4  ;;  %v551_v50 = vld [vmem:[#allocation5 + $0x60] sm:$0xff] }
 0x5e1   :  { %v327_v51 = vpop.permute.xlu1 %326 }
 0x5e2   :  { %2274 = vmatmul.mubr.msk.f32.vlgmr.msra.gmra.mrb[0].mxu0 %vm221_vm2, %v327_v51  ;;  %v552_v51 = vld [vmem:[#allocation5 + $0x68] sm:$0xff] }
 0x5e3   :  { %2388 = vmatpush3.bf16.msra.mxu0 %v2387_v14  ;;  %v603_v14 = vld [vmem:[#allocation5 + $0x200] sm:$0xff] }
 0x5e4   :  { %2390 = vmatprep.subr.bf16.mxu0 %v2389_v15  ;;  %v604_v15 = vld [vmem:[#allocation5 + $0x208] sm:$0xff] }
 0x5e5   :  { %v2451_v17 = vpack.c.bf16 %v604_v15, %v603_v14  ;;  %v671_v14 = vld [vmem:[#allocation5 + $0x420] sm:$0xff]  ;;  %v672_v15 = vld [vmem:[#allocation5 + $0x428] sm:$0xff] }
 0x5e7   :  { %2392 = vmatpush3.bf16.msra.mxu0 %v2391_v20  ;;  %v606_v20 = vld [vmem:[#allocation5 + $0x218] sm:$0xff] }
 0x5e8   :  { %2394 = vmatprep.subr.bf16.mxu0 %v2393_v21  ;;  %v2455_v22 = vpack.c.bf16 %v606_v20, %v605_v19  ;;  %v675_v20 = vld [vmem:[#allocation5 + $0x440] sm:$0xff] }
 0x5eb   :  { %2396 = vmatpush3.bf16.msra.mxu0 %v2395_v29  ;;  %v625_v29 = vld [vmem:[#allocation5 + $0x2b0] sm:$0xff] }
 0x5ec   :  { %2398 = vmatprep.subr.bf16.mxu0 %v2397_v31  ;;  %v609_v31 = vld [vmem:[#allocation5 + $0x230] sm:$0xff]  ;;  %v2461_v33 = vpack.c.bf16 %v626_v30, %v625_v29 }
 0x5ed   :  { %v2463_v34 = vpack.c.bf16 %v610_v32, %v609_v31  ;;  %v681_v30 = vld [vmem:[#allocation5 + $0x470] sm:$0xff]  ;;  %v682_v31 = vld [vmem:[#allocation5 + $0x478] sm:$0xff] }
 0x5ee   :  { %v2535_v32 = vpack.c.bf16 %v682_v31, %v681_v30  ;;  %v1190_v31 = vld [vmem:[#allocation7 + $0x2f0] sm:$0xff] }
 0x5ef   :  { %2400 = vmatpush3.bf16.msra.mxu0 %v2399_v36  ;;  %v692_v36 = vcombine.high %v536_v6, %v536_v6 }
 0x5f0   :  { %2402 = vmatprep.subr.bf16.mxu0 %v2401_v37  ;;  %v628_v37 = vld [vmem:[#allocation5 + $0x2c8] sm:$0xff] }
 0x5f3   :  { %2404 = vmatpush3.bf16.msra.mxu0 %v2403_v40  ;;  %v2465_v40 = vpack.c.bf16 %v628_v37, %v627_v35  ;;  %v685_v35 = vld [vmem:[#allocation5 + $0x490] sm:$0xff] }
 0x5f4   :  { %2406 = vmatprep.subr.bf16.mxu0 %v2405_v43  ;;  %v629_v43 = vld [vmem:[#allocation5 + $0x2d0] sm:$0xff] }
 0x5f5   :  { %v2469_v45 = vpack.c.bf16 %v630_v44, %v629_v43  ;;  %v1176_v44 = vld [vmem:[#allocation7 + $0x280] sm:$0xff] }
 0x5f7   :  { %2408 = vmatpush3.bf16.msra.mxu0 %v2407_v46  ;;  %v613_v46 = vld [vmem:[#allocation5 + $0x250] sm:$0xff] }
 0x5f8   :  { %2410 = vmatprep.subr.bf16.mxu0 %v2409_v49  ;;  %v2471_v48 = vpack.c.bf16 %v614_v47, %v613_v46  ;;  %v631_v49 = vld [vmem:[#allocation5 + $0x2e0] sm:$0xff]  ;;  %v1160_v47 = vld [vmem:[#allocation7 + $0x200] sm:$0xff] }
 0x6b5   :  { %v396_v52 = vpop.f32.mrb[0].mxu0 }
 0x6b6   :  { %v401_v53 = vrot.slane %v396_v52, 4  ;;  %v2275_v54 = vpop.f32.mrb[1].mxu0  ;;  %v2955_v52 = vmov 1983009808  }
 0x6b7   :  { %v696_v54 = vlaneseq }
 0x6b8   :  { %v403_v55 = vadd.f32 %v401_v53, %v3111_v8  ;;  %v694_v53 = vunpack.c.l.s4 %v2955_v52  ;;  %v615_v52 = vld [vmem:[#allocation5 + $0x260] sm:$0xff] }
 0x6ba   :  { %2787 = vtanh.f32 %v403_v55  ;;  %v404_v57 = vsub.f32 0.0, %v403_v55  ;;  %v2411_v55 = vpack.c.bf16 %v552_v51, %v551_v50  ;;  %v632_v50 = vld [vmem:[#allocation5 + $0x2e8] sm:$0xff] }
 0x6bb   :  { %v2473_v51 = vpack.c.bf16 %v632_v50, %v631_v49  ;;  %v1178_v50 = vld [vmem:[#allocation7 + $0x290] sm:$0xff] }
 0x6bc   :  { %v405_v58 = vmul.f32 1.442695, %v404_v57  ;;  %v697_v57 = vshrl.u32 %v696_v54, 7  ;;  %2412 = vmatpush3.bf16.msra.mxu0 %v2411_v55  ;;  %v633_v55 = vld [vmem:[#allocation5 + $0x2f0] sm:$0xff] }
 0x6be   :  { %2789 = vpow2.f32 %v405_v58  ;;  %v569_v58 = vld [vmem:[#allocation5 + $0xf0] sm:$0xff] }
 0x6c4   :  { %v2788_v56 = vpop.eup %2787 }
 0x6c5   :  { %415 = vrot.lane.b32.xlu0 %v2788_v56, %s2953_s2  ;;  %v695_v56 = vunpack.c.0.s8 %v694_v53  ;;  %v616_v53 = vld [vmem:[#allocation5 + $0x268] sm:$0xff] }
 0x6c6   :  { %v2475_v54 = vpack.c.bf16 %v616_v53, %v615_v52  ;;  %v1162_v52 = vld [vmem:[#allocation7 + $0x210] sm:$0xff]  ;;  %v1163_v53 = vld [vmem:[#allocation7 + $0x218] sm:$0xff] }
 0x6c8   :  { %v2790_v59 = vpop.eup %2789 }
 0x6c9   :  { %v407_v60 = vadd.f32 1.0, %v2790_v59  ;;  %v570_v59 = vld [vmem:[#allocation5 + $0xf8] sm:$0xff] }
 0x6cb   :  { %2791 = vrcp.f32 %v407_v60  ;;  %v2413_v60 = vpack.c.bf16 %v570_v59, %v569_v58  ;;  %v617_v58 = vld [vmem:[#allocation5 + $0x270] sm:$0xff]  ;;  %v618_v59 = vld [vmem:[#allocation5 + $0x278] sm:$0xff] }
 0x6cd   :  { %2414 = vmatprep.subr.bf16.mxu0 %v2413_v60  ;;  %v2479_v60 = vpack.c.bf16 %v618_v59, %v617_v58  ;;  %v1164_v58 = vld [vmem:[#allocation7 + $0x220] sm:$0xff]  ;;  %v1165_v59 = vld [vmem:[#allocation7 + $0x228] sm:$0xff] }
 0x6d5   :  { %v3146_v61 = vpop.eup %2791 }
 0x6d6   :  { %v413_v3 = vmul.f32 %v3146_v61, %v411_v2  ;;  %v3155_v2 = vsub.s32 %v695_v56, %v697_v57  ;;  %v634_v56 = vld [vmem:[#allocation5 + $0x2f8] sm:$0xff] }
 0x6d7   :  { %v2477_v57 = vpack.c.bf16 %v634_v56, %v633_v55  ;;  %v2616_v55 = vpack.c.bf16 %v1163_v53, %v1162_v52  ;;  %v1180_v56 = vld [vmem:[#allocation7 + $0x2a0] sm:$0xff]  ;;  %v574_v53 = vld [vmem:[#allocation5 + $0x118] sm:$0xff] }
 0x6d8   :  { %v3162_v9 = vrot.slane %v536_v6, %v3155_v2  ;;  %v3172_v42 = vrot.slane %v692_v36, %v3155_v2  ;;  %v668_v6 = vld [vmem:[#allocation5 + $0x408] sm:$0xff]  ;;  %v686_v36 = vld [vmem:[#allocation5 + $0x498] sm:$0xff]  ;;  %v573_v52 = vld [vmem:[#allocation5 + $0x110] sm:$0xff] }
 0x6d9   :  { %v2541_v37 = vpack.c.bf16 %v686_v36, %v685_v35  ;;  %v1224_v36 = vld [vmem:[#allocation7 + $0x400] sm:$0xff] }
 0x6da   :  { %v3166_v12 = vcombine.high %v3162_v9, %v3162_v9 }
 0x6dc   :  { %810 = vmatprep.mubr.f32.mxu0 %v3166_v12 }
 0x737   :  { %v416_v62 = vpop.permute.xlu0 %415 }
 0x738   :  { %v418_v63 = vmul.f32 %v3146_v61, %v416_v62  ;;  %v553_v62 = vld [vmem:[#allocation5 + $0x70] sm:$0xff] }
 0x73a   :  { %420 = vrot.lane.b32.xlu1 %v418_v63, %s2954_s4  ;;  %v554_v63 = vld [vmem:[#allocation5 + $0x78] sm:$0xff] }
 0x7ac   :  { %v421_v4 = vpop.permute.xlu1 %420 }
 0x7ad   :  { %v3151_v5 = vadd.f32 %v421_v4, %v413_v3  ;;  %v2415_v4 = vpack.c.bf16 %v554_v63, %v553_v62  ;;  %v537_v62 = vld [vmem:[%s3412_s1 + $0x8] sm:$0xff] }
 0x7ae   :  { %v3178_v63 = vrot.slane %v537_v62, %v3155_v2  ;;  %v709_v19 = vcombine.high %v537_v62, %v537_v62  ;;  %v2620_v62 = vpack.c.bf16 %v1165_v59, %v1164_v58  ;;  %v2423_v58 = vpack.c.bf16 %v574_v53, %v573_v52  ;;  %v585_v53 = vld [vmem:[#allocation5 + $0x170] sm:$0xff] }
 0x7af   :  { %2793 = vtanh.f32 %v3151_v5  ;;  %2416 = vmatpush3.bf16.msra.mxu0 %v2415_v4  ;;  %v667_v4 = vld [vmem:[#allocation5 + $0x400] sm:$0xff] }
 0x7b0   :  { %2450 = vmatprep.subr.bf16.mxu0 %v2449_v16  ;;  %v2520_v16 = vpack.c.bf16 %v672_v15, %v671_v14  ;;  %v3192_v23 = vrot.slane %v709_v19, %v3155_v2  ;;  %v683_v2 = vld [vmem:[#allocation5 + $0x480] sm:$0xff]  ;;  %v1185_v14 = vld [vmem:[#allocation7 + $0x2c8] sm:$0xff]  ;;  %v1168_v15 = vld [vmem:[#allocation7 + $0x240] sm:$0xff] }
 0x7b1   :  { %v1187_v19 = vld [vmem:[#allocation7 + $0x2d8] sm:$0xff] }
 0x7b2   :  { %811 = vmatmul.mubr.f32.vlgmr.msra.gmra.mrb[2].mxu0 %v3162_v9 }
 0x7b3   :  { %2452 = vmatpush3.bf16.msra.mxu0 %v2451_v17  ;;  %v673_v17 = vld [vmem:[#allocation5 + $0x430] sm:$0xff] }
 0x7b9   :  { %v2794_v28 = vpop.eup %2793 }
 0x7ba   :  { %426 = vrot.lane.b32.xlu0 %v2794_v28, %s2953_s2  ;;  %v2459_v28 = vpack.c.bf16 %v608_v26, %v607_v25  ;;  %v678_v25 = vld [vmem:[#allocation5 + $0x458] sm:$0xff] }
 0x7bb   :  { %v2529_v26 = vpack.c.bf16 %v678_v25, %v677_v24  ;;  %v1188_v25 = vld [vmem:[#allocation7 + $0x2e0] sm:$0xff] }
 0x82c   :  { %v427_v3 = vpop.permute.xlu0 %426 }
 0x82d   :  { %v429_v7 = vmul.f32 %v3146_v61, %v427_v3  ;;  %v621_v61 = vld [vmem:[#allocation5 + $0x290] sm:$0xff]  ;;  %v3182_v3 = vcombine.high %v3178_v63, %v3178_v63 }
 0x82e   :  { %v2453_v21 = vpack.c.bf16 %v622_v18, %v621_v61  ;;  %v674_v61 = vld [vmem:[#allocation5 + $0x438] sm:$0xff] }
 0x82f   :  { %v431_v11 = vrot.slane %v429_v7, 4  ;;  %v2514_v7 = vpack.c.bf16 %v668_v6, %v667_v4  ;;  %950 = vmatprep.mubr.f32.mxu0 %v3182_v3  ;;  %v2523_v18 = vpack.c.bf16 %v674_v61, %v673_v17  ;;  %v1182_v4 = vld [vmem:[#allocation7 + $0x2b0] sm:$0xff]  ;;  %v1183_v6 = vld [vmem:[#allocation7 + $0x2b8] sm:$0xff] }
 0x830   :  { %2454 = vmatprep.subr.bf16.mxu0 %v2453_v21  ;;  %v676_v21 = vld [vmem:[#allocation5 + $0x448] sm:$0xff] }
 0x831   :  { %432 = vrot.lane.b32.xlu1 %v431_v11, %s2954_s4  ;;  %2456 = vmatpush3.bf16.msra.mxu0 %v2455_v22  ;;  %v670_v11 = vld [vmem:[#allocation5 + $0x418] sm:$0xff]  ;;  %v2526_v22 = vpack.c.bf16 %v676_v21, %v675_v20  ;;  %v1170_v20 = vld [vmem:[#allocation7 + $0x250] sm:$0xff]  ;;  %v1171_v21 = vld [vmem:[#allocation7 + $0x258] sm:$0xff] }
 0x832   :  { %2458 = vmatprep.subr.bf16.mxu0 %v2457_v27  ;;  %v2517_v13 = vpack.c.bf16 %v670_v11, %v669_v10  ;;  %v679_v27 = vld [vmem:[#allocation5 + $0x460] sm:$0xff]  ;;  %v1167_v10 = vld [vmem:[#allocation7 + $0x238] sm:$0xff]  ;;  %v2622_v11 = vpack.c.bf16 %v1183_v6, %v1182_v4  ;;  %v2632_v24 = vpack.c.bf16 %v1171_v21, %v1170_v20  ;;  %v593_v4 = vld [vmem:[#allocation5 + $0x1b0] sm:$0xff] }
 0x833   :  { %v594_v6 = vld [vmem:[#allocation5 + $0x1b8] sm:$0xff] }
 0x835   :  { %2460 = vmatpush3.bf16.msra.mxu0 %v2459_v28  ;;  %v680_v28 = vld [vmem:[#allocation5 + $0x468] sm:$0xff] }
 0x836   :  { %2462 = vmatprep.subr.bf16.mxu0 %v2461_v33  ;;  %v2532_v29 = vpack.c.bf16 %v680_v28, %v679_v27  ;;  %v684_v33 = vld [vmem:[#allocation5 + $0x488] sm:$0xff]  ;;  %v1172_v27 = vld [vmem:[#allocation7 + $0x260] sm:$0xff]  ;;  %v1173_v28 = vld [vmem:[#allocation7 + $0x268] sm:$0xff] }
 0x837   :  { %v2636_v30 = vpack.c.bf16 %v1173_v28, %v1172_v27  ;;  %v1234_v27 = vld [vmem:[#allocation7 + $0x450] sm:$0xff]  ;;  %v1235_v28 = vld [vmem:[#allocation7 + $0x458] sm:$0xff] }
 0x839   :  { %2464 = vmatpush3.bf16.msra.mxu0 %v2463_v34  ;;  %v2538_v34 = vpack.c.bf16 %v684_v33, %v683_v2  ;;  %v1174_v2 = vld [vmem:[#allocation7 + $0x270] sm:$0xff]  ;;  %v1175_v33 = vld [vmem:[#allocation7 + $0x278] sm:$0xff] }
 0x83a   :  { %2466 = vmatprep.subr.bf16.mxu0 %v2465_v40  ;;  %v2544_v40 = vpack.c.bf16 %v688_v39, %v687_v38  ;;  %v2640_v35 = vpack.c.bf16 %v1175_v33, %v1174_v2  ;;  %v571_v39 = vld [vmem:[#allocation5 + $0x100] sm:$0xff]  ;;  %v582_v2 = vld [vmem:[#allocation5 + $0x158] sm:$0xff] }
 0x83b   :  { %v599_v33 = vld [vmem:[#allocation5 + $0x1e0] sm:$0xff] }
 0x83d   :  { %2468 = vmatpush3.bf16.msra.mxu0 %v2467_v41  ;;  %v3203_v41 = vld.sshfl [vmem:[%s3412_s1 + $0x10] sm:$0x33 pattern:$0x76325410] }
 0x83e   :  { %2470 = vmatprep.subr.bf16.mxu0 %v2469_v45  ;;  %v3207_v43 = vcombine.high %v3203_v41, %v3203_v41  ;;  %v1177_v45 = vld [vmem:[#allocation7 + $0x288] sm:$0xff] }
 0x83f   :  { %v2610_v46 = vpack.c.bf16 %v1177_v45, %v1176_v44  ;;  %v589_v44 = vld [vmem:[#allocation5 + $0x190] sm:$0xff]  ;;  %v590_v45 = vld [vmem:[#allocation5 + $0x198] sm:$0xff] }
 0x841   :  { %2472 = vmatpush3.bf16.msra.mxu0 %v2471_v48  ;;  %v1161_v48 = vld [vmem:[#allocation7 + $0x208] sm:$0xff] }
 0x842   :  { %2474 = vmatprep.subr.bf16.mxu0 %v2473_v51  ;;  %v2612_v49 = vpack.c.bf16 %v1161_v48, %v1160_v47  ;;  %v1179_v51 = vld [vmem:[#allocation7 + $0x298] sm:$0xff] }
 0x843   :  { %v1227_v47 = vld [vmem:[#allocation7 + $0x418] sm:$0xff] }
 0x845   :  { %2476 = vmatpush3.bf16.msra.mxu0 %v2475_v54  ;;  %v2614_v54 = vpack.c.bf16 %v1179_v51, %v1178_v50  ;;  %v3220_v50 = vcombine.high %v3172_v42, %v3172_v42  ;;  %v2421_v51 = vpack.c.bf16 %v590_v45, %v589_v44  ;;  %v584_v44 = vld [vmem:[#allocation5 + $0x168] sm:$0xff]  ;;  %v601_v45 = vld [vmem:[#allocation5 + $0x1f0] sm:$0xff] }
 0x846   :  { %2478 = vmatprep.subr.bf16.mxu0 %v2477_v57  ;;  %v1181_v57 = vld [vmem:[#allocation7 + $0x2a8] sm:$0xff] }
 0x849   :  { %2480 = vmatpush3.bf16.msra.mxu0 %v2479_v60  ;;  %v2618_v60 = vpack.c.bf16 %v1181_v57, %v1180_v56  ;;  %v1228_v56 = vld [vmem:[#allocation7 + $0x420] sm:$0xff]  ;;  %v1229_v57 = vld [vmem:[#allocation7 + $0x428] sm:$0xff] }
 0x84a   :  { %2513 = vmatprep.subr.bf16.mxu0 %v2950_v0 }
 0x84c   :  { %951 = vmatmul.mubr.f32.vlgmr.msra.gmra.mrb[4].mxu0 %v3178_v63 }
 0x84d   :  { %2515 = vmatpush1.bf16.msra.mxu0 %v2514_v7  ;;  %1904 = vmatprep.mubr.msk.f32.mxu0 %vm743_vm3, %v3207_v43  ;;  %v1166_v7 = vld [vmem:[#allocation7 + $0x230] sm:$0xff] }
 0x84e   :  { %2516 = vmatprep.subr.bf16.mxu0 %v2950_v0 }
 0x851   :  { %2518 = vmatpush1.bf16.msra.mxu0 %v2517_v13  ;;  %v2624_v13 = vpack.c.bf16 %v1167_v10, %v1166_v7  ;;  %v1230_v7 = vld [vmem:[#allocation7 + $0x430] sm:$0xff]  ;;  %v1231_v10 = vld [vmem:[#allocation7 + $0x438] sm:$0xff] }
 0x852   :  { %2519 = vmatprep.subr.bf16.mxu0 %v2950_v0 }
 0x855   :  { %2521 = vmatpush1.bf16.msra.mxu0 %v2520_v16  ;;  %v1169_v16 = vld [vmem:[#allocation7 + $0x248] sm:$0xff] }
 0x856   :  { %2522 = vmatprep.subr.bf16.mxu0 %v2950_v0  ;;  %v2628_v61 = vpack.c.bf16 %v1169_v16, %v1168_v15  ;;  %v578_v15 = vld [vmem:[#allocation5 + $0x138] sm:$0xff]  ;;  %v595_v16 = vld [vmem:[#allocation5 + $0x1c0] sm:$0xff] }
 0x859   :  { %2524 = vmatpush1.bf16.msra.mxu0 %v2523_v18  ;;  %v1186_v18 = vld [vmem:[#allocation7 + $0x2d0] sm:$0xff] }
 0x85a   :  { %2525 = vmatprep.subr.bf16.mxu0 %v2950_v0 }
 0x85d   :  { %2527 = vmatpush1.bf16.msra.mxu0 %v2526_v22  ;;  %v2630_v22 = vpack.c.bf16 %v1187_v19, %v1186_v18  ;;  %v1233_v18 = vld [vmem:[#allocation7 + $0x448] sm:$0xff] }
 0x85e   :  { %2528 = vmatprep.subr.bf16.mxu0 %v2950_v0 }
 0x861   :  { %2530 = vmatpush1.bf16.msra.mxu0 %v2529_v26  ;;  %v1189_v26 = vld [vmem:[#allocation7 + $0x2e8] sm:$0xff] }
 0x862   :  { %2531 = vmatprep.subr.bf16.mxu0 %v2950_v0 }
 0x865   :  { %2533 = vmatpush1.bf16.msra.mxu0 %v2532_v29  ;;  %v2634_v29 = vpack.c.bf16 %v1189_v26, %v1188_v25  ;;  %v597_v25 = vld [vmem:[#allocation5 + $0x1d0] sm:$0xff]  ;;  %v598_v26 = vld [vmem:[#allocation5 + $0x1d8] sm:$0xff] }
 0x866   :  { %2534 = vmatprep.subr.bf16.mxu0 %v2950_v0 }
 0x869   :  { %2536 = vmatpush1.bf16.msra.mxu0 %v2535_v32  ;;  %v1191_v32 = vld [vmem:[#allocation7 + $0x2f8] sm:$0xff] }
 0x86a   :  { %2537 = vmatprep.subr.bf16.mxu0 %v2950_v0 }
 0x86d   :  { %2539 = vmatpush1.bf16.msra.mxu0 %v2538_v34  ;;  %v2638_v34 = vpack.c.bf16 %v1191_v32, %v1190_v31  ;;  %v2437_v31 = vpack.c.bf16 %v598_v26, %v597_v25  ;;  %v581_v32 = vld [vmem:[#allocation5 + $0x150] sm:$0xff]  ;;  %v640_v25 = vld [vmem:[#allocation5 + $0x328] sm:$0xff] }
 0x86e   :  { %2540 = vmatprep.subr.bf16.mxu0 %v2950_v0  ;;  %v657_v26 = vld [vmem:[#allocation5 + $0x3b0] sm:$0xff] }
 0x871   :  { %2542 = vmatpush1.bf16.msra.mxu0 %v2541_v37  ;;  %v1225_v37 = vld [vmem:[#allocation7 + $0x408] sm:$0xff] }
 0x872   :  { %2543 = vmatprep.subr.bf16.mxu0 %v2950_v0  ;;  %v2675_v38 = vpack.c.bf16 %v1225_v37, %v1224_v36  ;;  %v1237_v36 = vld [vmem:[#allocation7 + $0x468] sm:$0xff] }
 0x875   :  { %2545 = vmatpush1.bf16.msra.mxu0 %v2544_v40  ;;  %v572_v40 = vld [vmem:[#allocation5 + $0x108] sm:$0xff] }
 0x876   :  { %2611 = vmatprep.subr.bf16.mxu0 %v2610_v46  ;;  %v1226_v46 = vld [vmem:[#allocation7 + $0x410] sm:$0xff] }
 0x877   :  { %v2678_v48 = vpack.c.bf16 %v1227_v47, %v1226_v46  ;;  %v602_v46 = vld [vmem:[#allocation5 + $0x1f8] sm:$0xff]  ;;  %v1238_v47 = vld [vmem:[#allocation7 + $0x470] sm:$0xff] }
 0x878   :  { %1091 = vmatmul.mubr.f32.vlgmr.msra.gmra.mrb[6].mxu0 %v3203_v41  ;;  %v2445_v52 = vpack.c.bf16 %v602_v46, %v601_v45  ;;  %v646_v45 = vld [vmem:[#allocation5 + $0x358] sm:$0xff]  ;;  %v664_v46 = vld [vmem:[#allocation5 + $0x3e8] sm:$0xff] }
 0x879   :  { %2613 = vmatpush3.bf16.msra.mxu0 %v2612_v49  ;;  %1450 = vmatprep.mubr.f32.mxu0 %v3182_v3  ;;  %v1184_v3 = vld [vmem:[#allocation7 + $0x2c0] sm:$0xff]  ;;  %v2419_v49 = vpack.c.bf16 %v572_v40, %v571_v39  ;;  %v583_v40 = vld [vmem:[#allocation5 + $0x160] sm:$0xff] }
 0x87a   :  { %2615 = vmatprep.subr.bf16.mxu0 %v2614_v54  ;;  %v2626_v17 = vpack.c.bf16 %v1185_v14, %v1184_v3  ;;  %v591_v54 = vld [vmem:[#allocation5 + $0x1a0] sm:$0xff]  ;;  %v2429_v3 = vpack.c.bf16 %v594_v6, %v593_v4  ;;  %v577_v14 = vld [vmem:[#allocation5 + $0x130] sm:$0xff]  ;;  %v654_v6 = vld [vmem:[#allocation5 + $0x398] sm:$0xff] }
 0x87b   :  { %v2431_v20 = vpack.c.bf16 %v578_v15, %v577_v14  ;;  %v653_v4 = vld [vmem:[#allocation5 + $0x390] sm:$0xff] }
 0x87c   :  { %v2485_v14 = vpack.c.bf16 %v654_v6, %v653_v4  ;;  %v637_v15 = vld [vmem:[#allocation5 + $0x310] sm:$0xff]  ;;  %v1114_v4 = vld [vmem:[#allocation7 + $0x90] sm:$0xff]  ;;  %v1115_v6 = vld [vmem:[#allocation7 + $0x98] sm:$0xff] }
 0x87d   :  { %2617 = vmatpush3.bf16.msra.mxu0 %v2616_v55  ;;  %v592_v55 = vld [vmem:[#allocation5 + $0x1a8] sm:$0xff] }
 0x87e   :  { %2619 = vmatprep.subr.bf16.mxu0 %v2618_v60  ;;  %v2425_v59 = vpack.c.bf16 %v592_v55, %v591_v54  ;;  %v575_v60 = vld [vmem:[#allocation5 + $0x120] sm:$0xff]  ;;  %v586_v54 = vld [vmem:[#allocation5 + $0x178] sm:$0xff]  ;;  %v652_v55 = vld [vmem:[#allocation5 + $0x388] sm:$0xff] }
 0x881   :  { %2621 = vmatpush3.bf16.msra.mxu0 %v2620_v62  ;;  %v576_v62 = vld [vmem:[#allocation5 + $0x128] sm:$0xff] }
 0x882   :  { %2623 = vmatprep.subr.bf16.mxu0 %v2622_v11  ;;  %v2684_v11 = vpack.c.bf16 %v1231_v10, %v1230_v7  ;;  %v1242_v7 = vld [vmem:[#allocation7 + $0x490] sm:$0xff]  ;;  %v1243_v10 = vld [vmem:[#allocation7 + $0x498] sm:$0xff] }
 0x885   :  { %2625 = vmatpush3.bf16.msra.mxu0 %v2624_v13  ;;  %v2427_v13 = vpack.c.bf16 %v576_v62, %v575_v60  ;;  %v635_v60 = vld [vmem:[#allocation5 + $0x300] sm:$0xff]  ;;  %v636_v62 = vld [vmem:[#allocation5 + $0x308] sm:$0xff] }
 0x886   :  { %2627 = vmatprep.subr.bf16.mxu0 %v2626_v17  ;;  %v596_v17 = vld [vmem:[#allocation5 + $0x1c8] sm:$0xff] }
 0x887   :  { %v2433_v21 = vpack.c.bf16 %v596_v17, %v595_v16  ;;  %v638_v16 = vld [vmem:[#allocation5 + $0x318] sm:$0xff]  ;;  %v655_v17 = vld [vmem:[#allocation5 + $0x3a0] sm:$0xff] }
 0x889   :  { %2629 = vmatpush3.bf16.msra.mxu0 %v2628_v61  ;;  %v1232_v61 = vld [vmem:[#allocation7 + $0x440] sm:$0xff] }
 0x88a   :  { %2631 = vmatprep.subr.bf16.mxu0 %v2630_v22  ;;  %v2687_v19 = vpack.c.bf16 %v1233_v18, %v1232_v61  ;;  %v579_v22 = vld [vmem:[#allocation5 + $0x140] sm:$0xff]  ;;  %v656_v61 = vld [vmem:[#allocation5 + $0x3a8] sm:$0xff]  ;;  %v1244_v18 = vld [vmem:[#allocation7 + $0x4a0] sm:$0xff] }
 0x88d   :  { %2633 = vmatpush3.bf16.msra.mxu0 %v2632_v24  ;;  %v580_v24 = vld [vmem:[#allocation5 + $0x148] sm:$0xff] }
 0x88e   :  { %2635 = vmatprep.subr.bf16.mxu0 %v2634_v29  ;;  %v2690_v29 = vpack.c.bf16 %v1235_v28, %v1234_v27  ;;  %v658_v27 = vld [vmem:[#allocation5 + $0x3b8] sm:$0xff] }
 0x891   :  { %2637 = vmatpush3.bf16.msra.mxu0 %v2636_v30  ;;  %v2435_v30 = vpack.c.bf16 %v580_v24, %v579_v22  ;;  %v2489_v22 = vpack.c.bf16 %v656_v61, %v655_v17  ;;  %v639_v24 = vld [vmem:[#allocation5 + $0x320] sm:$0xff]  ;;  %v1100_v61 = vld [vmem:[#allocation7 + $0x20] sm:$0xff] }
 0x892   :  { %2639 = vmatprep.subr.bf16.mxu0 %v2638_v34  ;;  %v600_v34 = vld [vmem:[#allocation5 + $0x1e8] sm:$0xff]  ;;  %v2491_v28 = vpack.c.bf16 %v640_v25, %v639_v24  ;;  %v1102_v24 = vld [vmem:[#allocation7 + $0x30] sm:$0xff] }
 0x893   :  { %v2441_v39 = vpack.c.bf16 %v600_v34, %v599_v33  ;;  %v1103_v25 = vld [vmem:[#allocation7 + $0x38] sm:$0xff] }
 0x895   :  { %2641 = vmatpush3.bf16.msra.mxu0 %v2640_v35  ;;  %v1236_v35 = vld [vmem:[#allocation7 + $0x460] sm:$0xff] }
 0x896   :  { %2674 = vmatprep.subr.bf16.mxu0 %v2950_v0  ;;  %v2693_v37 = vpack.c.bf16 %v1237_v36, %v1236_v35  ;;  %v643_v35 = vld [vmem:[#allocation5 + $0x340] sm:$0xff]  ;;  %v644_v36 = vld [vmem:[#allocation5 + $0x348] sm:$0xff] }
 0x898   :  { %1451 = vmatmul.mubr.f32.vlgmr.msra.gmra.mrb[8].mxu0 %v3178_v63 }
 0x899   :  { %2676 = vmatpush1.bf16.msra.mxu0 %v2675_v38  ;;  %1905 = vmatprep.mubr.msk.f32.mxu0 %vm743_vm3, %v3207_v43  ;;  %v2681_v43 = vpack.c.bf16 %v1229_v57, %v1228_v56  ;;  %v2439_v38 = vpack.c.bf16 %v582_v2, %v581_v32  ;;  %v1240_v56 = vld [vmem:[#allocation7 + $0x480] sm:$0xff]  ;;  %v1241_v57 = vld [vmem:[#allocation7 + $0x488] sm:$0xff]  ;;  %v659_v32 = vld [vmem:[#allocation5 + $0x3c0] sm:$0xff] }
 0x89a   :  { %2677 = vmatprep.subr.bf16.mxu0 %v2950_v0  ;;  %v660_v2 = vld [vmem:[#allocation5 + $0x3c8] sm:$0xff] }
 0x89b   :  { %v2497_v34 = vpack.c.bf16 %v660_v2, %v659_v32  ;;  %v1123_v32 = vld [vmem:[#allocation7 + $0xd8] sm:$0xff] }
 0x89d   :  { %2679 = vmatpush1.bf16.msra.mxu0 %v2678_v48  ;;  %v1239_v48 = vld [vmem:[#allocation7 + $0x478] sm:$0xff] }
 0x89e   :  { %2680 = vmatprep.subr.bf16.mxu0 %v2950_v0 }
 0x8a1   :  { %2682 = vmatpush1.bf16.msra.mxu0 %v2681_v43  ;;  %v2699_v43 = vpack.c.bf16 %v1241_v57, %v1240_v56  ;;  %v650_v56 = vld [vmem:[#allocation5 + $0x378] sm:$0xff]  ;;  %v1112_v57 = vld [vmem:[#allocation7 + $0x80] sm:$0xff] }
 0x8a2   :  { %2683 = vmatprep.subr.bf16.mxu0 %v2950_v0 }
 0x8a3   :  { %v433_v63 = vpop.permute.xlu1 %432 }
 0x8a4   :  { %2285 = vmatmul.mubr.msk.f32.vlgmr.msra.gmra.mrb[4].mxu1 %vm221_vm2, %v433_v63  ;;  %v651_v63 = vld [vmem:[#allocation5 + $0x380] sm:$0xff] }
 0x8a5   :  { %2420 = vmatpush3.bf16.msra.mxu1 %v2419_v49  ;;  %880 = vmatprep.mubr.f32.mxu1 %v3220_v50  ;;  %v2696_v49 = vpack.c.bf16 %v1239_v48, %v1238_v47 }
 0x8a6   :  { %2422 = vmatprep.subr.bf16.mxu1 %v2421_v51  ;;  %2685 = vmatpush1.bf16.msra.mxu0 %v2684_v11  ;;  %v2443_v51 = vpack.c.bf16 %v584_v44, %v583_v40  ;;  %v2702_v11 = vpack.c.bf16 %v1243_v10, %v1242_v7  ;;  %v645_v44 = vld [vmem:[#allocation5 + $0x350] sm:$0xff]  ;;  %v2550_v10 = vpack.c.bf16 %v1115_v6, %v1114_v4  ;;  %v1149_v4 = vld [vmem:[#allocation7 + $0x1a8] sm:$0xff] }
 0x8a7   :  { %2686 = vmatprep.subr.bf16.mxu0 %v2950_v0  ;;  %v2503_v47 = vpack.c.bf16 %v646_v45, %v645_v44  ;;  %v1109_v44 = vld [vmem:[#allocation7 + $0x68] sm:$0xff]  ;;  %v1126_v45 = vld [vmem:[#allocation7 + $0xf0] sm:$0xff] }
 0x8a9   :  { %2424 = vmatpush3.bf16.msra.mxu1 %v2423_v58  ;;  %v2447_v58 = vpack.c.bf16 %v586_v54, %v585_v53  ;;  %v666_v53 = vld [vmem:[#allocation5 + $0x3f8] sm:$0xff] }
 0x8aa   :  { %2426 = vmatprep.subr.bf16.mxu1 %v2425_v59  ;;  %2688 = vmatpush1.bf16.msra.mxu0 %v2687_v19  ;;  %v2481_v59 = vpack.c.bf16 %v652_v55, %v651_v63  ;;  %v1245_v19 = vld [vmem:[#allocation7 + $0x4a8] sm:$0xff]  ;;  %v649_v55 = vld [vmem:[#allocation5 + $0x370] sm:$0xff] }
 0x8ab   :  { %2689 = vmatprep.subr.bf16.mxu0 %v2950_v0 }
 0x8ad   :  { %2428 = vmatpush3.bf16.msra.mxu1 %v2427_v13  ;;  %v2483_v13 = vpack.c.bf16 %v636_v62, %v635_v60  ;;  %v1096_v60 = vld [vmem:[#allocation7] sm:$0xff]  ;;  %v1097_v62 = vld [vmem:[#allocation7 + $0x8] sm:$0xff] }
 0x8ae   :  { %2430 = vmatprep.subr.bf16.mxu1 %v2429_v3  ;;  %2691 = vmatpush1.bf16.msra.mxu0 %v2690_v29  ;;  %v3234_v3 = vcombine.high %v3192_v23, %v3192_v23  ;;  %v2493_v29 = vpack.c.bf16 %v658_v27, %v657_v26  ;;  %v2548_v7 = vpack.c.bf16 %v1097_v62, %v1096_v60  ;;  %v1120_v26 = vld [vmem:[#allocation7 + $0xc0] sm:$0xff]  ;;  %v1121_v27 = vld [vmem:[#allocation7 + $0xc8] sm:$0xff]  ;;  %v1131_v60 = vld [vmem:[#allocation7 + $0x118] sm:$0xff] }
 0x8af   :  { %2692 = vmatprep.subr.bf16.mxu0 %v2950_v0  ;;  %v1148_v62 = vld [vmem:[#allocation7 + $0x1a0] sm:$0xff] }
 0x8b1   :  { %2432 = vmatpush3.bf16.msra.mxu1 %v2431_v20  ;;  %v2705_v20 = vpack.c.bf16 %v1245_v19, %v1244_v18  ;;  %v1101_v18 = vld [vmem:[#allocation7 + $0x28] sm:$0xff]  ;;  %v1118_v19 = vld [vmem:[#allocation7 + $0xb0] sm:$0xff] }
 0x8b2   :  { %2434 = vmatprep.subr.bf16.mxu1 %v2433_v21  ;;  %2694 = vmatpush1.bf16.msra.mxu0 %v2693_v37  ;;  %v2487_v21 = vpack.c.bf16 %v638_v16, %v637_v15  ;;  %v661_v37 = vld [vmem:[#allocation5 + $0x3d0] sm:$0xff]  ;;  %v1117_v15 = vld [vmem:[#allocation7 + $0xa8] sm:$0xff] }
 0x8b3   :  { %2695 = vmatprep.subr.bf16.mxu0 %v2950_v0 }
 0x8b5   :  { %2436 = vmatpush3.bf16.msra.mxu1 %v2435_v30  ;;  %v641_v30 = vld [vmem:[#allocation5 + $0x330] sm:$0xff] }
 0x8b6   :  { %2438 = vmatprep.subr.bf16.mxu1 %v2437_v31  ;;  %2697 = vmatpush1.bf16.msra.mxu0 %v2696_v49  ;;  %v642_v31 = vld [vmem:[#allocation5 + $0x338] sm:$0xff]  ;;  %v647_v49 = vld [vmem:[#allocation5 + $0x360] sm:$0xff] }
 0x8b7   :  { %2698 = vmatprep.subr.bf16.mxu0 %v2950_v0  ;;  %v2495_v33 = vpack.c.bf16 %v642_v31, %v641_v30  ;;  %v1104_v30 = vld [vmem:[#allocation7 + $0x40] sm:$0xff]  ;;  %v1122_v31 = vld [vmem:[#allocation7 + $0xd0] sm:$0xff] }
 0x8b9   :  { %2440 = vmatpush3.bf16.msra.mxu1 %v2439_v38  ;;  %v662_v38 = vld [vmem:[#allocation5 + $0x3d8] sm:$0xff] }
 0x8ba   :  { %2442 = vmatprep.subr.bf16.mxu1 %v2441_v39  ;;  %2700 = vmatpush1.bf16.msra.mxu0 %v2699_v43  ;;  %v2499_v39 = vpack.c.bf16 %v644_v36, %v643_v35  ;;  %v2501_v40 = vpack.c.bf16 %v662_v38, %v661_v37  ;;  %v1113_v43 = vld [vmem:[#allocation7 + $0x88] sm:$0xff]  ;;  %v1107_v35 = vld [vmem:[#allocation7 + $0x58] sm:$0xff]  ;;  %v1124_v36 = vld [vmem:[#allocation7 + $0xe0] sm:$0xff] }
 0x8bb   :  { %2701 = vmatprep.subr.bf16.mxu0 %v2950_v0  ;;  %v1125_v37 = vld [vmem:[#allocation7 + $0xe8] sm:$0xff] }
 0x8bd   :  { %2444 = vmatpush3.bf16.msra.mxu1 %v2443_v51  ;;  %v648_v51 = vld [vmem:[#allocation5 + $0x368] sm:$0xff] }
 0x8be   :  { %2446 = vmatprep.subr.bf16.mxu1 %v2445_v52  ;;  %2703 = vmatpush1.bf16.msra.mxu0 %v2702_v11  ;;  %v665_v52 = vld [vmem:[#allocation5 + $0x3f0] sm:$0xff]  ;;  %v2507_v54 = vpack.c.bf16 %v648_v51, %v647_v49  ;;  %v1098_v11 = vld [vmem:[#allocation7 + $0x10] sm:$0xff]  ;;  %v1111_v49 = vld [vmem:[#allocation7 + $0x78] sm:$0xff] }
 0x8bf   :  { %2704 = vmatprep.subr.bf16.mxu0 %v2950_v0  ;;  %v2509_v63 = vpack.c.bf16 %v666_v53, %v665_v52  ;;  %v1144_v51 = vld [vmem:[#allocation7 + $0x180] sm:$0xff]  ;;  %v1145_v52 = vld [vmem:[#allocation7 + $0x188] sm:$0xff] }
 0x8c1   :  { %2448 = vmatpush3.bf16.msra.mxu1 %v2447_v58  ;;  %v2511_v58 = vpack.c.bf16 %v650_v56, %v649_v55  ;;  %v1129_v55 = vld [vmem:[#allocation7 + $0x108] sm:$0xff]  ;;  %v1146_v56 = vld [vmem:[#allocation7 + $0x190] sm:$0xff] }
 0x8c2   :  { %2482 = vmatprep.subr.bf16.mxu1 %v2481_v59  ;;  %2706 = vmatpush1.bf16.msra.mxu0 %v2705_v20  ;;  %v2546_v59 = vpack.c.bf16 %v1113_v43, %v1112_v57  ;;  %v1119_v20 = vld [vmem:[#allocation7 + $0xb8] sm:$0xff] }
 0x8c3   :  { %2728 = vmatprep.subr.bf16.mxu0 %v2950_v0  ;;  %v1147_v57 = vld [vmem:[#allocation7 + $0x198] sm:$0xff] }
 0x8c4   :  { %881 = vmatmul.mubr.f32.vlgmr.msra.gmra.mrb[6].mxu1 %v3172_v42 }
 0x8c5   :  { %2484 = vmatpush3.bf16.msra.mxu1 %v2483_v13  ;;  %1020 = vmatprep.mubr.f32.mxu1 %v3234_v3  ;;  %v1099_v13 = vld [vmem:[#allocation7 + $0x18] sm:$0xff] }
 0x8c6   :  { %2486 = vmatprep.subr.bf16.mxu1 %v2485_v14  ;;  %1591 = vmatmul.mubr.f32.vlgmr.msra.gmra.mrb[10].mxu0 %v3203_v41  ;;  %v663_v41 = vld [vmem:[#allocation5 + $0x3e0] sm:$0xff]  ;;  %v1116_v14 = vld [vmem:[#allocation7 + $0xa0] sm:$0xff]  ;;  %v2552_v16 = vpack.c.bf16 %v1099_v13, %v1098_v11  ;;  %v1133_v11 = vld [vmem:[#allocation7 + $0x128] sm:$0xff] }
 0x8c7   :  { %2350 = vmatprep.mubr.msk.f32.mxu0 %vm2951_vm0, %v2952_v1  ;;  %v2505_v48 = vpack.c.bf16 %v664_v46, %v663_v41  ;;  %v2554_v17 = vpack.c.bf16 %v1117_v15, %v1116_v14  ;;  %v1127_v41 = vld [vmem:[#allocation7 + $0xf8] sm:$0xff]  ;;  %v1150_v13 = vld [vmem:[#allocation7 + $0x1b0] sm:$0xff] }
 0x8c8   :  { %v1151_v14 = vld [vmem:[#allocation7 + $0x1b8] sm:$0xff] }
 0x8c9   :  { %2488 = vmatpush3.bf16.msra.mxu1 %v2487_v21  ;;  %v2556_v21 = vpack.c.bf16 %v1101_v18, %v1100_v61  ;;  %v1135_v61 = vld [vmem:[#allocation7 + $0x138] sm:$0xff]  ;;  %v1152_v18 = vld [vmem:[#allocation7 + $0x1c0] sm:$0xff] }
 0x8ca   :  { %2490 = vmatprep.subr.bf16.mxu1 %v2489_v22  ;;  %v2558_v22 = vpack.c.bf16 %v1119_v20, %v1118_v19  ;;  %v1153_v19 = vld [vmem:[#allocation7 + $0x1c8] sm:$0xff]  ;;  %v1962_v20 = vpop.f32.mrb[2].mxu0 }
 0x8cd   :  { %2492 = vmatpush3.bf16.msra.mxu1 %v2491_v28  ;;  %v2560_v28 = vpack.c.bf16 %v1103_v25, %v1102_v24  ;;  %v1154_v24 = vld [vmem:[#allocation7 + $0x1d0] sm:$0xff]  ;;  %v1155_v25 = vld [vmem:[#allocation7 + $0x1d8] sm:$0xff] }
 0x8ce   :  { %2494 = vmatprep.subr.bf16.mxu1 %v2493_v29  ;;  %v2562_v29 = vpack.c.bf16 %v1121_v27, %v1120_v26  ;;  %v2598_v27 = vpack.c.bf16 %v1155_v25, %v1154_v24  ;;  %v1220_v24 = vld [vmem:[#allocation7 + $0x3e0] sm:$0xff]  ;;  %v1221_v25 = vld [vmem:[#allocation7 + $0x3e8] sm:$0xff] }
 0x8d1   :  { %2496 = vmatpush3.bf16.msra.mxu1 %v2495_v33  ;;  %v2566_v33 = vpack.c.bf16 %v1123_v32, %v1122_v31 }
 0x8d2   :  { %2498 = vmatprep.subr.bf16.mxu1 %v2497_v34  ;;  %v1106_v34 = vld [vmem:[#allocation7 + $0x50] sm:$0xff] }
 0x8d3   :  { %v2568_v38 = vpack.c.bf16 %v1107_v35, %v1106_v34  ;;  %v1158_v34 = vld [vmem:[#allocation7 + $0x1f0] sm:$0xff]  ;;  %v1159_v35 = vld [vmem:[#allocation7 + $0x1f8] sm:$0xff] }
 0x8d5   :  { %2500 = vmatpush3.bf16.msra.mxu1 %v2499_v39  ;;  %v2570_v39 = vpack.c.bf16 %v1125_v37, %v1124_v36  ;;  %v1963_v36 = vpop.f32.mrb[3].mxu0 }
 0x8d6   :  { %2502 = vmatprep.subr.bf16.mxu1 %v2501_v40  ;;  %v1108_v40 = vld [vmem:[#allocation7 + $0x60] sm:$0xff]  ;;  %v3247_v37 = vadd.f32 %v1963_v36, %v1962_v20 }
 0x8d7   :  { %v2572_v46 = vpack.c.bf16 %v1109_v44, %v1108_v40  ;;  %v1142_v40 = vld [vmem:[#allocation7 + $0x170] sm:$0xff]  ;;  %v1143_v44 = vld [vmem:[#allocation7 + $0x178] sm:$0xff] }
 0x8d9   :  { %2504 = vmatpush3.bf16.msra.mxu1 %v2503_v47  ;;  %v2574_v47 = vpack.c.bf16 %v1127_v41, %v1126_v45  ;;  %v1208_v45 = vld [vmem:[#allocation7 + $0x380] sm:$0xff]  ;;  %v1209_v41 = vld [vmem:[#allocation7 + $0x388] sm:$0xff] }
 0x8da   :  { %2506 = vmatprep.subr.bf16.mxu1 %v2505_v48  ;;  %v1110_v48 = vld [vmem:[#allocation7 + $0x70] sm:$0xff] }
 0x8db   :  { %v2576_v53 = vpack.c.bf16 %v1111_v49, %v1110_v48  ;;  %v1192_v48 = vld [vmem:[#allocation7 + $0x300] sm:$0xff]  ;;  %v1193_v49 = vld [vmem:[#allocation7 + $0x308] sm:$0xff] }
 0x8dd   :  { %2508 = vmatpush3.bf16.msra.mxu1 %v2507_v54  ;;  %v2578_v54 = vpack.c.bf16 %v1145_v52, %v1144_v51  ;;  %v1210_v51 = vld [vmem:[#allocation7 + $0x390] sm:$0xff]  ;;  %v1211_v52 = vld [vmem:[#allocation7 + $0x398] sm:$0xff] }
 0x8de   :  { %2510 = vmatprep.subr.bf16.mxu1 %v2509_v63  ;;  %v1128_v63 = vld [vmem:[#allocation7 + $0x100] sm:$0xff] }
 0x8df   :  { %v2580_v43 = vpack.c.bf16 %v1129_v55, %v1128_v63  ;;  %v1194_v63 = vld [vmem:[#allocation7 + $0x310] sm:$0xff]  ;;  %v1195_v55 = vld [vmem:[#allocation7 + $0x318] sm:$0xff] }
 0x8e1   :  { %2512 = vmatpush3.bf16.msra.mxu1 %v2511_v58  ;;  %v2582_v58 = vpack.c.bf16 %v1147_v57, %v1146_v56  ;;  %v1212_v56 = vld [vmem:[#allocation7 + $0x3a0] sm:$0xff]  ;;  %v1213_v57 = vld [vmem:[#allocation7 + $0x3a8] sm:$0xff] }
 0x8e2   :  { %2547 = vmatprep.subr.bf16.mxu1 %v2546_v59  ;;  %v1130_v59 = vld [vmem:[#allocation7 + $0x110] sm:$0xff] }
 0x8e3   :  { %v2584_v6 = vpack.c.bf16 %v1131_v60, %v1130_v59  ;;  %v2650_v59 = vpack.c.bf16 %v1213_v57, %v1212_v56  ;;  %v1196_v60 = vld [vmem:[#allocation7 + $0x320] sm:$0xff] }
 0x8e4   :  { %1021 = vmatmul.mubr.f32.vlgmr.msra.gmra.mrb[8].mxu1 %v3192_v23 }
 0x8e5   :  { %2549 = vmatpush3.bf16.msra.mxu1 %v2548_v7  ;;  %1310 = vmatprep.mubr.f32.mxu1 %v3166_v12  ;;  %v1105_v12 = vld [vmem:[#allocation7 + $0x48] sm:$0xff]  ;;  %v2586_v7 = vpack.c.bf16 %v1149_v4, %v1148_v62 }
 0x8e6   :  { %2551 = vmatprep.subr.bf16.mxu1 %v2550_v10  ;;  %v2564_v2 = vpack.c.bf16 %v1105_v12, %v1104_v30  ;;  %v1132_v10 = vld [vmem:[#allocation7 + $0x120] sm:$0xff]  ;;  %v1157_v12 = vld [vmem:[#allocation7 + $0x1e8] sm:$0xff] }
 0x8e7   :  { %v2588_v15 = vpack.c.bf16 %v1133_v11, %v1132_v10  ;;  %v1156_v30 = vld [vmem:[#allocation7 + $0x1e0] sm:$0xff]  ;;  %v1197_v62 = vld [vmem:[#allocation7 + $0x328] sm:$0xff] }
 0x8e8   :  { %v2602_v32 = vpack.c.bf16 %v1157_v12, %v1156_v30  ;;  %v2652_v11 = vpack.c.bf16 %v1197_v62, %v1196_v60  ;;  %v1222_v30 = vld [vmem:[#allocation7 + $0x3f0] sm:$0xff]  ;;  %v1223_v12 = vld [vmem:[#allocation7 + $0x3f8] sm:$0xff] }
 0x8e9   :  { %2553 = vmatpush3.bf16.msra.mxu1 %v2552_v16  ;;  %v2590_v16 = vpack.c.bf16 %v1151_v14, %v1150_v13  ;;  %v1198_v14 = vld [vmem:[#allocation7 + $0x330] sm:$0xff] }
 0x8ea   :  { %2555 = vmatprep.subr.bf16.mxu1 %v2554_v17  ;;  %v1134_v17 = vld [vmem:[#allocation7 + $0x130] sm:$0xff] }
 0x8ed   :  { %2557 = vmatpush3.bf16.msra.mxu1 %v2556_v21  ;;  %v2594_v21 = vpack.c.bf16 %v1153_v19, %v1152_v18  ;;  %v1201_v18 = vld [vmem:[#allocation7 + $0x348] sm:$0xff]  ;;  %v1218_v19 = vld [vmem:[#allocation7 + $0x3d0] sm:$0xff] }
 0x8ee   :  { %2559 = vmatprep.subr.bf16.mxu1 %v2558_v22  ;;  %v1137_v22 = vld [vmem:[#allocation7 + $0x148] sm:$0xff] }
 0x8f1   :  { %2561 = vmatpush3.bf16.msra.mxu1 %v2560_v28  ;;  %v1138_v28 = vld [vmem:[#allocation7 + $0x150] sm:$0xff] }
 0x8f2   :  { %2563 = vmatprep.subr.bf16.mxu1 %v2562_v29  ;;  %v1139_v29 = vld [vmem:[#allocation7 + $0x158] sm:$0xff] }
 0x8f3   :  { %v2600_v31 = vpack.c.bf16 %v1139_v29, %v1138_v28  ;;  %v1204_v28 = vld [vmem:[#allocation7 + $0x360] sm:$0xff]  ;;  %v1205_v29 = vld [vmem:[#allocation7 + $0x368] sm:$0xff] }
 0x8f5   :  { %2565 = vmatpush3.bf16.msra.mxu1 %v2564_v2  ;;  %v1140_v2 = vld [vmem:[#allocation7 + $0x160] sm:$0xff] }
 0x8f6   :  { %2567 = vmatprep.subr.bf16.mxu1 %v2566_v33  ;;  %v1141_v33 = vld [vmem:[#allocation7 + $0x168] sm:$0xff] }
 0x8f9   :  { %2569 = vmatpush3.bf16.msra.mxu1 %v2568_v38  ;;  %v2604_v38 = vpack.c.bf16 %v1141_v33, %v1140_v2  ;;  %v1206_v2 = vld [vmem:[#allocation7 + $0x370] sm:$0xff]  ;;  %v1207_v33 = vld [vmem:[#allocation7 + $0x378] sm:$0xff] }
 0x8fa   :  { %2571 = vmatprep.subr.bf16.mxu1 %v2570_v39  ;;  %v2606_v39 = vpack.c.bf16 %v1159_v35, %v1158_v34  ;;  %v2672_v34 = vpack.c.bf16 %v1207_v33, %v1206_v2  ;;  %v1707_v2 = vld [vmem:[%s3421_s10] sm:$0xff]  ;;  %v1708_v33 = vld [vmem:[%s3421_s10 + $0x8] sm:$0xff] }
 0x8fd   :  { %2573 = vmatpush3.bf16.msra.mxu1 %v2572_v46  ;;  %v2608_v46 = vpack.c.bf16 %v1143_v44, %v1142_v40 }
 0x8fe   :  { %2575 = vmatprep.subr.bf16.mxu1 %v2574_v47  ;;  %v2642_v47 = vpack.c.bf16 %v1209_v41, %v1208_v45  ;;  %v1606_v45 = vld [vmem:[%s3419_s8] sm:$0xff]  ;;  %v1607_v41 = vld [vmem:[%s3419_s8 + $0x8] sm:$0xff] }
 0x901   :  { %2577 = vmatpush3.bf16.msra.mxu1 %v2576_v53  ;;  %v2644_v53 = vpack.c.bf16 %v1193_v49, %v1192_v48  ;;  %v1609_v48 = vld [vmem:[%s3419_s8 + $0x18] sm:$0xff] }
 0x902   :  { %2579 = vmatprep.subr.bf16.mxu1 %v2578_v54  ;;  %v2646_v54 = vpack.c.bf16 %v1211_v52, %v1210_v51  ;;  %v1610_v52 = vld [vmem:[%s3419_s8 + $0x20] sm:$0xff] }
 0x904   :  { %1311 = vmatmul.mubr.f32.vlgmr.msra.gmra.mrb[10].mxu1 %v3162_v9  ;;  %v2592_v9 = vpack.c.bf16 %v1135_v61, %v1134_v17  ;;  %v1200_v61 = vld [vmem:[#allocation7 + $0x340] sm:$0xff] }
 0x905   :  { %2581 = vmatpush3.bf16.msra.mxu1 %v2580_v43  ;;  %1380 = vmatprep.mubr.f32.mxu1 %v3220_v50  ;;  %v1136_v50 = vld [vmem:[#allocation7 + $0x140] sm:$0xff]  ;;  %v2648_v43 = vpack.c.bf16 %v1195_v55, %v1194_v63  ;;  %v2660_v20 = vpack.c.bf16 %v1201_v18, %v1200_v61  ;;  %v1612_v63 = vld [vmem:[%s3419_s8 + $0x30] sm:$0xff] }
 0x906   :  { %2583 = vmatprep.subr.bf16.mxu1 %v2582_v58  ;;  %v2596_v26 = vpack.c.bf16 %v1137_v22, %v1136_v50  ;;  %v1202_v50 = vld [vmem:[#allocation7 + $0x350] sm:$0xff]  ;;  %v1203_v22 = vld [vmem:[#allocation7 + $0x358] sm:$0xff]  ;;  %v1613_v55 = vld [vmem:[%s3419_s8 + $0x38] sm:$0xff] }
 0x907   :  { %v2717_v57 = vpack.c.bf16 %v1613_v55, %v1612_v63  ;;  %v517_v55 = vrot.slane %v3151_v5, 6  ;;  %v1717_v5 = vld [vmem:[%s3421_s10 + $0x50] sm:$0xff] }
 0x909   :  { %2585 = vmatpush3.bf16.msra.mxu1 %v2584_v6  ;;  %v1214_v6 = vld [vmem:[#allocation7 + $0x3b0] sm:$0xff] }
 0x90a   :  { %2587 = vmatprep.subr.bf16.mxu1 %v2586_v7  ;;  %v1215_v7 = vld [vmem:[#allocation7 + $0x3b8] sm:$0xff] }
 0x90b   :  { %v2654_v13 = vpack.c.bf16 %v1215_v7, %v1214_v6  ;;  %v1616_v6 = vld [vmem:[%s3419_s8 + $0x50] sm:$0xff]  ;;  %v1617_v7 = vld [vmem:[%s3419_s8 + $0x58] sm:$0xff] }
 0x90d   :  { %2589 = vmatpush3.bf16.msra.mxu1 %v2588_v15  ;;  %v1216_v15 = vld [vmem:[#allocation7 + $0x3c0] sm:$0xff] }
 0x90e   :  { %2591 = vmatprep.subr.bf16.mxu1 %v2590_v16  ;;  %v1217_v16 = vld [vmem:[#allocation7 + $0x3c8] sm:$0xff] }
 0x90f   :  { %v2658_v17 = vpack.c.bf16 %v1217_v16, %v1216_v15  ;;  %v1618_v15 = vld [vmem:[%s3419_s8 + $0x60] sm:$0xff]  ;;  %v1619_v16 = vld [vmem:[%s3419_s8 + $0x68] sm:$0xff] }
 0x911   :  { %2593 = vmatpush3.bf16.msra.mxu1 %v2592_v9  ;;  %v1219_v9 = vld [vmem:[#allocation7 + $0x3d8] sm:$0xff] }
 0x912   :  { %2595 = vmatprep.subr.bf16.mxu1 %v2594_v21  ;;  %v2662_v21 = vpack.c.bf16 %v1219_v9, %v1218_v19 }
 0x915   :  { %2597 = vmatpush3.bf16.msra.mxu1 %v2596_v26  ;;  %v2664_v26 = vpack.c.bf16 %v1203_v22, %v1202_v50 }
 0x916   :  { %2599 = vmatprep.subr.bf16.mxu1 %v2598_v27  ;;  %v2666_v27 = vpack.c.bf16 %v1221_v25, %v1220_v24 }
 0x919   :  { %2601 = vmatpush3.bf16.msra.mxu1 %v2600_v31  ;;  %v2668_v31 = vpack.c.bf16 %v1205_v29, %v1204_v28 }
 0x91a   :  { %2603 = vmatprep.subr.bf16.mxu1 %v2602_v32  ;;  %v2670_v32 = vpack.c.bf16 %v1223_v12, %v1222_v30 }
 0x91d   :  { %2605 = vmatpush3.bf16.msra.mxu1 %v2604_v38 }
 0x91e   :  { %2607 = vmatprep.subr.bf16.mxu1 %v2606_v39 }
 0x91f   :  { %v2032_v58 = vpop.f32.mrb[4].mxu0 }
 0x920   :  { %v2033_v4 = vpop.f32.mrb[5].mxu0 }
 0x921   :  { %2609 = vmatpush3.bf16.msra.mxu1 %v2608_v46  ;;  %v3251_v10 = vadd.f32 %v2033_v4, %v2032_v58  ;;  %v1615_v58 = vld [vmem:[%s3419_s8 + $0x48] sm:$0xff] }
 0x922   :  { %2643 = vmatprep.subr.bf16.mxu1 %v2642_v47  ;;  %v2708_v47 = vpack.c.bf16 %v1607_v41, %v1606_v45  ;;  %v1713_v41 = vld [vmem:[%s3421_s10 + $0x30] sm:$0xff] }
 0x924   :  { %1381 = vmatmul.mubr.f32.vlgmr.msra.gmra.mrb[12].mxu1 %v3172_v42  ;;  %v1199_v42 = vld [vmem:[#allocation7 + $0x338] sm:$0xff] }
 0x925   :  { %2645 = vmatpush3.bf16.msra.mxu1 %v2644_v53  ;;  %1520 = vmatprep.mubr.f32.mxu1 %v3234_v3  ;;  %v2656_v3 = vpack.c.bf16 %v1199_v42, %v1198_v14  ;;  %v1611_v53 = vld [vmem:[%s3419_s8 + $0x28] sm:$0xff] }
 0x926   :  { %2647 = vmatprep.subr.bf16.mxu1 %v2646_v54  ;;  %v2714_v54 = vpack.c.bf16 %v1611_v53, %v1610_v52  ;;  %v1906_v52 = vld [vmem:[#allocation8] ss:$0 sm:$0xff] }
 0x929   :  { %2649 = vmatpush3.bf16.msra.mxu1 %v2648_v43  ;;  %v1614_v43 = vld [vmem:[%s3419_s8 + $0x40] sm:$0xff] }
 0x92a   :  { %2651 = vmatprep.subr.bf16.mxu1 %v2650_v59  ;;  %v2720_v59 = vpack.c.bf16 %v1615_v58, %v1614_v43  ;;  %v1716_v43 = vld [vmem:[%s3421_s10 + $0x48] sm:$0xff] }
 0x92d   :  { %2653 = vmatpush3.bf16.msra.mxu1 %v2652_v11  ;;  %v2723_v11 = vpack.c.bf16 %v1617_v7, %v1616_v6  ;;  %v1719_v6 = vld [vmem:[%s3421_s10 + $0x60] sm:$0xff]  ;;  %v1720_v7 = vld [vmem:[%s3421_s10 + $0x68] sm:$0xff] }
 0x92e   :  { %2655 = vmatprep.subr.bf16.mxu1 %v2654_v13 }
 0x931   :  { %2657 = vmatpush3.bf16.msra.mxu1 %v2656_v3  ;;  %v2726_v3 = vpack.c.bf16 %v1619_v16, %v1618_v15  ;;  %v1704_v15 = vld [vmem:[%s3422_s11 + $0x8] sm:$0xff] }
 0x932   :  { %2659 = vmatprep.subr.bf16.mxu1 %v2658_v17 }
 0x935   :  { %2661 = vmatpush3.bf16.msra.mxu1 %v2660_v20 }
 0x936   :  { %2663 = vmatprep.subr.bf16.mxu1 %v2662_v21 }
 0x939   :  { %2665 = vmatpush3.bf16.msra.mxu1 %v2664_v26 }
 0x93a   :  { %2667 = vmatprep.subr.bf16.mxu1 %v2666_v27 }
 0x93d   :  { %2669 = vmatpush3.bf16.msra.mxu1 %v2668_v31 }
 0x93e   :  { %2671 = vmatprep.subr.bf16.mxu1 %v2670_v32 }
 0x941   :  { %2673 = vmatpush3.bf16.msra.mxu1 %v2672_v34  ;;  %v1709_v34 = vld [vmem:[%s3421_s10 + $0x10] sm:$0xff] }
 0x942   :  { %2707 = vmatprep.subr.bf16.mxu1 %v2950_v0 }
 0x944   :  { %1521 = vmatmul.mubr.f32.vlgmr.msra.gmra.mrb[14].mxu1 %v3192_v23  ;;  %v1608_v23 = vld [vmem:[%s3419_s8 + $0x10] sm:$0xff] }
 0x945   :  { %2317 = vmatprep.mubr.msk.f32.mxu1 %vm2951_vm0, %v2952_v1  ;;  %2709 = vmatpush3.bf16.msra.mxu1 %v2708_v47  ;;  %v2711_v51 = vpack.c.bf16 %v1609_v48, %v1608_v23  ;;  %v1714_v23 = vld [vmem:[%s3421_s10 + $0x38] sm:$0xff] }
 0x946   :  { %2710 = vmatprep.subr.bf16.mxu1 %v2950_v0 }
 0x949   :  { %2712 = vmatpush3.bf16.msra.mxu1 %v2711_v51 }
 0x94a   :  { %2713 = vmatprep.subr.bf16.mxu1 %v2950_v0 }
 0x94b   :  { %v1092_v35 = vpop.f32.mrb[6].mxu0 }
 0x94c   :  { %v1094_v36 = vpop.f32.mrb[7].mxu0 }
 0x94d   :  { %2715 = vmatpush3.bf16.msra.mxu1 %v2714_v54  ;;  %v2729_v36 = vpack.c.bf16 %v1708_v33, %v1707_v2 }
 0x94e   :  { %2716 = vmatprep.subr.bf16.mxu1 %v2950_v0 }
 0x94f   :  { %2730 = vmatpush3.bf16.msra.mxu0 %v2729_v36 }
 0x950   :  { %2731 = vmatprep.subr.bf16.mxu0 %v2950_v0 }
 0x951   :  { %2718 = vmatpush3.bf16.msra.mxu1 %v2717_v57  ;;  %v1715_v57 = vld [vmem:[%s3421_s10 + $0x40] sm:$0xff] }
 0x952   :  { %2719 = vmatprep.subr.bf16.mxu1 %v2950_v0 }
 0x955   :  { %2721 = vmatpush3.bf16.msra.mxu1 %v2720_v59  ;;  %v2741_v59 = vpack.c.bf16 %v1716_v43, %v1715_v57 }
 0x956   :  { %2722 = vmatprep.subr.bf16.mxu1 %v2950_v0 }
 0x959   :  { %2724 = vmatpush3.bf16.msra.mxu1 %v2723_v11  ;;  %v2747_v11 = vpack.c.bf16 %v1720_v7, %v1719_v6 }
 0x95a   :  { %2725 = vmatprep.subr.bf16.mxu1 %v2950_v0 }
 0x95d   :  { %2727 = vmatpush3.bf16.msra.mxu1 %v2726_v3  ;;  %v1706_v3 = vld [vmem:[%s3422_s11 + $0x18] sm:$0xff] }
 0x95e   :  { %2315 = vmatprep.subr.mxu1 %v2952_v1 }
 0x96b   :  { %v2172_v46 = vpop.f32.mrb[8].mxu0 }
 0x977   :  { %v502_v38 = vpop.f32.mrb[4].mxu1 }
 0x978   :  { %v507_v39 = vrot.slane %v502_v38, 2  ;;  %v2286_v40 = vpop.f32.mrb[5].mxu1  ;;  %v1710_v38 = vld [vmem:[%s3421_s10 + $0x18] sm:$0xff] }
 0x979   :  { %v1711_v40 = vld [vmem:[%s3421_s10 + $0x20] sm:$0xff] }
 0x97a   :  { %v509_v44 = vadd.f32 %v507_v39, %v3111_v8  ;;  %v2173_v8 = vpop.f32.mrb[9].mxu0  ;;  %v2732_v39 = vpack.c.bf16 %v1710_v38, %v1709_v34 }
 0x97b   :  { %v3270_v49 = vadd.f32 %v2173_v8, %v2172_v46  ;;  %v2738_v46 = vpack.c.bf16 %v1714_v23, %v1713_v41 }
 0x97c   :  { %2795 = vtanh.f32 %v509_v44  ;;  %v510_v20 = vsub.f32 0.0, %v509_v44  ;;  %v1712_v44 = vld [vmem:[%s3421_s10 + $0x28] sm:$0xff]  ;;  %2733 = vmatpush3.bf16.msra.mxu0 %v2732_v39 }
 0x97d   :  { %v2735_v45 = vpack.c.bf16 %v1712_v44, %v1711_v40  ;;  %2734 = vmatprep.subr.bf16.mxu0 %v2950_v0 }
 0x97e   :  { %v511_v24 = vmul.f32 1.442695, %v510_v20 }
 0x980   :  { %2797 = vpow2.f32 %v511_v24  ;;  %2736 = vmatpush3.bf16.msra.mxu0 %v2735_v45 }
 0x981   :  { %2737 = vmatprep.subr.bf16.mxu0 %v2950_v0 }
 0x984   :  { %2739 = vmatpush3.bf16.msra.mxu0 %v2738_v46 }
 0x985   :  { %2740 = vmatprep.subr.bf16.mxu0 %v2950_v0 }
 0x986   :  { %v2796_v56 = vpop.eup %2795 }
 0x987   :  { %521 = vrot.lane.b32.xlu0 %v2796_v56, %s2953_s2 }
 0x988   :  { %2742 = vmatpush3.bf16.msra.mxu0 %v2741_v59 }
 0x989   :  { %2743 = vmatprep.subr.bf16.mxu0 %v2950_v0 }
 0x98a   :  { %v2798_v25 = vpop.eup %2797 }
 0x98b   :  { %v513_v26 = vadd.f32 1.0, %v2798_v25  ;;  %v1911_v25 = vld [vmem:[%s3423_s12] ss:$0 sm:$0xff] }
 0x98d   :  { %2799 = vrcp.f32 %v513_v26 }
 0x997   :  { %v1997_v60 = vpop.f32.mrb[6].mxu1  ;;  %v3316_v29 = vpop.eup %2799 }
 0x998   :  { %v1998_v62 = vpop.f32.mrb[7].mxu1  ;;  %v519_v56 = vmul.f32 %v3316_v29, %v517_v55 }
 0x999   :  { %v1999_v4 = vadd.f32 %v1998_v62, %v1997_v60  ;;  %v1592_v42 = vpop.f32.mrb[10].mxu0  ;;  %v1718_v62 = vld [vmem:[%s3421_s10 + $0x58] sm:$0xff] }
 0x99a   :  { %v1594_v17 = vpop.f32.mrb[11].mxu0 }
 0x99b   :  { %v883_v13 = vadd.f32 %v1999_v4, %v3247_v37  ;;  %v1620_v37 = vld [vmem:[%s3419_s8 + $0x70] sm:$0xff]  ;;  %v2744_v4 = vpack.c.bf16 %v1718_v62, %v1717_v5 }
 0x99c   :  { %2316 = vmatpush3.msra.mxu1 %v1620_v37 }
 0x99d   :  { %v953_v14 = vadd.f32 %v3251_v10, %v883_v13  ;;  %2749 = vmatprep.subr.bf16.mxu1 %v2950_v0  ;;  %2745 = vmatpush3.bf16.msra.mxu0 %v2744_v4 }
 0x99e   :  { %2746 = vmatprep.subr.bf16.mxu0 %v2950_v0 }
 0x9a1   :  { %2748 = vmatpush3.bf16.msra.mxu0 %v2747_v11 }
 0x9a2   :  { %2348 = vmatprep.subr.mxu0 %v2952_v1 }
 0x9b7   :  { %v2067_v10 = vpop.f32.mrb[8].mxu1 }
 0x9b8   :  { %v2068_v61 = vpop.f32.mrb[9].mxu1 }
 0x9b9   :  { %v2069_v18 = vadd.f32 %v2068_v61, %v2067_v10 }
 0x9bb   :  { %v1023_v19 = vadd.f32 %v2069_v18, %v953_v14  ;;  %v1721_v14 = vld [vmem:[%s3421_s10 + $0x70] sm:$0xff]  ;;  %v1907_v18 = vld [vmem:[#allocation10] ss:$0 sm:$0xff] }
 0x9bc   :  { %2349 = vmatpush3.msra.mxu0 %v1721_v14 }
 0x9bd   :  { %v1093_v9 = vadd.f32 %v1092_v35, %v1023_v19 }
 0x9d7   :  { %v2102_v21 = vpop.f32.mrb[10].mxu1 }
 0x9d8   :  { %v2103_v50 = vpop.f32.mrb[11].mxu1 }
 0x9d9   :  { %v2104_v22 = vadd.f32 %v2103_v50, %v2102_v21 }
 0x9f7   :  { %v2137_v27 = vpop.f32.mrb[12].mxu1 }
 0x9f8   :  { %v2138_v28 = vpop.f32.mrb[13].mxu1 }
 0x9f9   :  { %v522_v30 = vpop.permute.xlu0 %521  ;;  %v2139_v12 = vadd.f32 %v2138_v28, %v2137_v27 }
 0x9fa   :  { %v524_v31 = vmul.f32 %v3316_v29, %v522_v30 }
 0x9fb   :  { %v1383_v32 = vadd.f32 %v2139_v12, %v2104_v22 }
 0x9fc   :  { %526 = vrot.lane.b32.xlu1 %v524_v31, %s2954_s4 }
 0x9fd   :  { %v1453_v35 = vadd.f32 %v3270_v49, %v1383_v32 }
 0xa17   :  { %v2207_v47 = vpop.f32.mrb[14].mxu1 }
 0xa18   :  { %v2208_v48 = vpop.f32.mrb[15].mxu1 }
 0xa19   :  { %v2209_v8 = vadd.f32 %v2208_v48, %v2207_v47 }
 0xa1b   :  { %v1523_v49 = vadd.f32 %v2209_v8, %v1453_v35 }
 0xa1d   :  { %v1593_v51 = vadd.f32 %v1592_v42, %v1523_v49  ;;  %v1703_v42 = vld [vmem:[%s3422_s11] sm:$0xff] }
 0xa1e   :  { %v2750_v16 = vpack.c.bf16 %v1704_v15, %v1703_v42 }
 0xa1f   :  { %v1596_v53 = vmax.f32 %v1093_v9, %v1593_v51 }
 0xa21   :  { %v1604_v54 = vadd.f32 %v1906_v52, %v1596_v53 }
 0xa23   :  { %v1605_v63 = vmax.f32 %v1604_v54, 0.0 }
 0xa25   :  { %2318 = vmatmul.mubr.msk.f32.vlgmr.msra.gmra.mrb[16].mxu1 %vm1628_vm4, %v1605_v63 }
 0xa26   :  { %2361 = vmatprep.mubr.msk.f32.mxu1 %vm2951_vm0, %v2952_v1  ;;  %v1705_v1 = vld [vmem:[%s3422_s11 + $0x10] sm:$0xff]  ;;  %2751 = vmatpush3.bf16.msra.mxu1 %v2750_v16 }
 0xa27   :  { %v2753_v17 = vpack.c.bf16 %v1706_v3, %v1705_v1  ;;  %2752 = vmatprep.subr.bf16.mxu1 %v2950_v0 }
 0xa2a   :  { %2754 = vmatpush3.bf16.msra.mxu1 %v2753_v17 }
 0xa6e   :  { %v527_v58 = vpop.permute.xlu1 %526 }
 0xa6f   :  { %v529_v60 = vadd.f32 %v527_v58, %v519_v56 }
 0xa71   :  { %2801 = vtanh.f32 %v529_v60 }
 0xa7b   :  { %v2802_v13 = vpop.eup %2801 }
 0xa7c   :  { %532 = vrot.lane.b32.xlu0 %v2802_v13, %s2953_s2  ;;  %s2956_s2 = smov [#allocation11]  }
 0xa7d   :  { %s1887_s3 = sshll.u32 %s2956_s2, 4  ;;  %s1888_s3 = int_to_ptr.vmem [resolvable:$true] %s1887_s3 }
 0xa7e   :  { %p2918_p13 = scmp.lt.s32.totalorder %s1888_s3, %s1888_s3 }
 0xaee   :  { %v533_v37 = vpop.permute.xlu0 %532 }
 0xaef   :  { %v535_v10 = vmul.f32 %v3316_v29, %v533_v37 }
 0xaf1   :  { %v1796_v61 = vrot.slane %v535_v10, 6 }
 0xaf3   :  { %1797 = vrot.lane.b32.xlu1 %v1796_v61, %s2954_s4  ;;  %s2913_s4 = scalar_lea.vmem %s1888_s3, 32 }
 0xaf4   :  { %p2914_p12 = scmp.ne.s32.totalorder %s1888_s3, %s2913_s4  ;;  %p2919_p0 = scmp.lt.s32.totalorder %s2913_s4, %s2913_s4 }
 0xaf6   :  { %p2920_p1 = por %p2919_p0, %p2918_p13 }
 0xaf8   :  { %v1698_v19 = vpop.f32.mrb[16].mxu1  ;;  %p2921_p2 = pnand %p2920_p1, %p2914_p12 }
 0xaf9   :  { %v1699_v9 = vadd.f32 %v1907_v18, %v1698_v19  ;;  %v2319_v20 = vpop.f32.mrb[17].mxu1 }
 0xafb   :  { %v1702_v21 = vmax.f32 %v1699_v9, 0.0 }
 0xafd   :  { %2351 = vmatmul.mubr.msk.f32.vlgmr.msra.gmra.mrb[12].mxu0 %vm1628_vm4, %v1702_v21 }
 0xb65   :  { %v1798_v50 = vpop.permute.xlu1 %1797 }
 0xb66   :  { %2362 = vmatmul.mubr.msk.f32.vlgmr.msra.gmra.mrb[18].mxu1 %vm221_vm2, %v1798_v50 }
 0xbd0   :  { %v1791_v22 = vpop.f32.mrb[12].mxu0 }
 0xbd1   :  { %v2352_v24 = vpop.f32.mrb[13].mxu0 }
 0xc39   :  { %v1867_v0 = vpop.f32.mrb[18].mxu1 }
 0xc3a   :  { %v1868_v26 = vadd.f32 %v1867_v0, %v1791_v22  ;;  %v2363_v27 = vpop.f32.mrb[19].mxu1 }
 0xc3c   :  { %v1878_v28 = vadd.f32 %v1911_v25, %v1868_v26 }
 0xc3e   :  { %1880 = vst.msk [vmem:[#allocation11] sm:$0x3] %vm1879_vm5, %v1878_v28 }
 0xc3f   :  { %2924 = shalt.err (!%p2921_p2)
}
 0xc40   :  { %s2925_s5 = scalar_lea.hbm %s3424_s13, 32 }
 0xc41   :  { %p2926_p3 = scmp.ne.s32.totalorder %s3424_s13, %s2925_s5  ;;  %p2929_p4 = scmp.lt.u32.totalorder %s2925_s5, %s3424_s13 }
 0xc43   :  { %p2931_p5 = pnand %p2929_p4, %p2926_p3 }
 0xc45   :  { %2934 = shalt.err (!%p2931_p5)
}
 0xc46   :  { %1890 = dma.vmem_to_hbm [thread:$0]  %s1888_s3, 32, %s3424_s13, [#allocation4]  }
 0xc47   :  { %2941 = dma.done.wait [#allocation4], 32  }
 0xc48   :  { %2942 = vsyncadd [#allocation4], 4294967264 }
 0xc49   :  { %1894 = vsyncpa [#allocation3], 1 }
 0xc4a   :  { %1895 = vsyncpa [#allocation6], 1 }
 0xc4b   :  { %1896 = vsyncpa [#allocation9], 1 }
 0xc4c   :  { %1897 = vsyncpa [#allocation4], 1 }

</bundles_post_ra>
